<compile_context>
chip_gen: v6e
topology: v6e:2x2x1
jax: 0.10.0
libtpu: 0.0.40
codegen_flags: <defaults>
</compile_context>

<pallas_src>
import jax
import jax.numpy as jnp
from jax.experimental import pallas as pl
from jax.experimental.pallas import tpu as pltpu

LANE = 128


def _round_up(v, m):
    return (v + m - 1) // m * m


def _pad_to(w, shape):
    """Zero-pad a 2-D array to `shape` (exact: padded rows/cols contribute 0)."""
    out = jnp.zeros(shape, jnp.float32)
    return out.at[tuple(slice(0, s) for s in w.shape)].set(w)


def _fold_bn(w, b, s, t):
    """Fold eval-mode BatchNorm affine (y*s + t) into the preceding Linear."""
    return w * s, b * s + t


def _vmem_limit_bytes():
    """Scoped VMEM limit with headroom below the chip's physical capacity."""
    try:
        cap = int(pltpu.get_tpu_info().vmem_capacity_bytes)
    except Exception:
        cap = 64 * 1024 * 1024  # conservative (v7x) fallback
    return min(max(cap - 16 * 1024 * 1024, 32 * 1024 * 1024), 112 * 1024 * 1024)


# ---------------------------------------------------------------------------
# Fused Pallas kernel: conv1 -> conv2 -> conv3 -> head, all VMEM-resident.
# ---------------------------------------------------------------------------
def fused_gin_kernel(a_ref, x_ref,
                     cw1_ref, cb1_ref, cw2_ref, cb2_ref,
                     hw1_ref, hb1_ref, hw2_ref, hb2_ref, hw3_ref, hb3_ref,
                     o_ref):
    a = a_ref[...]                          # [Np, Np] bf16, (1+eps)*I folded into diagonal
    np_ = a.shape[0]
    dp = hb1_ref.shape[-1]

    h_bf = x_ref[...].astype(jnp.bfloat16)  # [Np, Hp] activations fed to the MXU in bf16
    y_acc = jnp.zeros((np_, dp), jnp.float32)   # head lin1 accumulator (built in-loop)

    for l in range(3):                      # statically unrolled: conv1, conv2, conv3
        # GIN aggregation: (1+eps)*x_i + sum_{j in N(i)} x_j  ==  A' @ x (diag-folded).
        # bf16 x bf16 on the MXU, f32 accumulation.
        g = jnp.dot(a, h_bf, preferred_element_type=jnp.float32)
        # MLP layer 1: Linear (+ folded eval-mode BN affine) -> ReLU
        z = jnp.maximum(
            jnp.dot(g.astype(jnp.bfloat16), cw1_ref[l],
                    preferred_element_type=jnp.float32) + cb1_ref[l], 0.0)
        # MLP layer 2: Linear (+ folded BN) -> ReLU.  The reference's outer
        # F.relu(convk(x)) is a no-op after this ReLU, so it is dropped.
        h = jnp.maximum(
            jnp.dot(z.astype(jnp.bfloat16), cw2_ref[l],
                    preferred_element_type=jnp.float32) + cb2_ref[l], 0.0)
        h_bf = h.astype(jnp.bfloat16)
        # Head lin1 acts on cat([x1, x2, x3], dim=1); accumulate its block
        # matmul here so no concat slab is built and x1/x2/x3 are never kept.
        y_acc = y_acc + jnp.dot(h_bf, hw1_ref[l],
                                preferred_element_type=jnp.float32)

    # lin1: (+ bias) -> ReLU
    y = jnp.maximum(y_acc + hb1_ref[...], 0.0)
    # lin2: Linear -> ReLU -> Dropout(0.5) [identity at inference]
    y = jnp.maximum(
        jnp.dot(y.astype(jnp.bfloat16), hw2_ref[...],
                preferred_element_type=jnp.float32) + hb2_ref[...], 0.0)
    # output Linear padded to 128 output lanes (column 0 is the real logit) + outer ReLU.
    o_ref[...] = jnp.maximum(
        jnp.dot(y.astype(jnp.bfloat16), hw3_ref[...],
                preferred_element_type=jnp.float32) + hb3_ref[...], 0.0)


# ---------------------------------------------------------------------------
# Wrapper: densify + fold BN + pad + stack params, one pallas_call, slice out.
# ---------------------------------------------------------------------------
def gin_conv_net_forward(x, edge_index, params, eps=0.0):
    """Full GINConvNet forward. `batch` is unused by the reference forward."""
    n, f = x.shape
    hidden = params["conv2"]["w1"].shape[0]
    hp = _round_up(hidden, LANE)              # padded hidden width (lane-dense)
    dp = _round_up(3 * hidden, LANE)          # padded head width
    np_ = _round_up(n, LANE)                  # padded node count (sublane/lane dense A)
    assert f <= hp, "node_features must fit the lane-padded hidden width"

    # Densify edge_index into A[dst, src] (duplicate edges accumulate), fold the
    # GIN (1+eps) self term into the diagonal, then cast to bf16 -- exact while
    # (edge multiplicity + 1 + eps) is bf16-representable (integers <= 256).
    a = jnp.zeros((np_, np_), jnp.float32)
    a = a.at[edge_index[1], edge_index[0]].add(1.0)
    a = a + (1.0 + eps) * jnp.eye(np_, dtype=jnp.float32)
    a = a.astype(jnp.bfloat16)

    # Node features zero-padded to [Np, Hp].
    xp = jnp.zeros((np_, hp), jnp.float32).at[:n, :f].set(x)

    # Fold BN into the conv MLP linears and stack into lane-padded [3, ...] slabs.
    # Weights go to bf16 (MXU operands); biases stay f32 (VPU adds).
    def stack_fold(wk, bk, sk, tk):
        ws, bs = [], []
        for k in (1, 2, 3):
            p = params["conv%d" % k]
            w, b = _fold_bn(p[wk], p[bk], p[sk], p[tk])
            ws.append(_pad_to(w, (hp, hp)))
            bs.append(_pad_to(b, (1, hp)))
        return jnp.stack(ws).astype(jnp.bfloat16), jnp.stack(bs)

    cw1, cb1 = stack_fold("w1", "b1", "s1", "t1")
    cw2, cb2 = stack_fold("w2", "b2", "s2", "t2")

    # Head: split lin1's input dim into the three per-layer blocks (replaces the
    # concat); pad everything to 128-lane widths; output linear padded to 128 lanes.
    hd = params["head"]
    hw1 = jnp.stack([_pad_to(hd["w1"][k * hidden:(k + 1) * hidden], (hp, dp))
                     for k in range(3)]).astype(jnp.bfloat16)
    hb1 = _pad_to(hd["b1"], (1, dp))
    hw2 = _pad_to(hd["w2"], (dp, dp)).astype(jnp.bfloat16)
    hb2 = _pad_to(hd["b2"], (1, dp))
    hw3 = _pad_to(hd["w3"], (dp, LANE)).astype(jnp.bfloat16)
    hb3 = _pad_to(hd["b3"], (1, LANE))

    args = (a, xp, cw1, cb1, cw2, cb2, hw1, hb1, hw2, hb2, hw3, hb3)

    flops = (2 * np_ * np_ * hp * 3                 # three A @ x aggregations
             + 2 * np_ * hp * hp * 6                # six conv MLP linears
             + 2 * np_ * (3 * hp * dp + dp * dp + dp * LANE))   # head
    bytes_accessed = (sum(int(v.size) * v.dtype.itemsize for v in args)
                      + np_ * LANE * 4)

    out = pl.pallas_call(
        fused_gin_kernel,
        out_shape=jax.ShapeDtypeStruct((np_, LANE), jnp.float32),
        in_specs=[pl.BlockSpec(memory_space=pltpu.MemorySpace.VMEM)] * len(args),
        out_specs=pl.BlockSpec(memory_space=pltpu.MemorySpace.VMEM),
        compiler_params=pltpu.CompilerParams(
            vmem_limit_bytes=_vmem_limit_bytes()),
        cost_estimate=pl.CostEstimate(flops=int(flops), transcendentals=0,
                                      bytes_accessed=int(bytes_accessed)),
    )(*args)
    return out[:n, :1]


# ---------------------------------------------------------------------------
# Pure-JAX reference (mirrors the PyTorch eval-mode forward) for validation.
# ---------------------------------------------------------------------------
def gin_forward_reference(x, edge_index, params, eps=0.0):
    n = x.shape[0]
    a = jnp.zeros((n, n), jnp.float32).at[edge_index[1], edge_index[0]].add(1.0)

    def conv(p, h):
        g = (1.0 + eps) * h + a @ h
        z = jnp.maximum((g @ p["w1"] + p["b1"]) * p["s1"] + p["t1"], 0.0)
        z = jnp.maximum((z @ p["w2"] + p["b2"]) * p["s2"] + p["t2"], 0.0)
        return jnp.maximum(z, 0.0)          # outer F.relu(convk(x))

    x1 = conv(params["conv1"], x)
    x2 = conv(params["conv2"], x1)
    x3 = conv(params["conv3"], x2)
    c = jnp.concatenate([x1, x2, x3], axis=1)
    hd = params["head"]
    y = jnp.maximum(c @ hd["w1"] + hd["b1"], 0.0)
    y = jnp.maximum(y @ hd["w2"] + hd["b2"], 0.0)     # dropout = identity (eval)
    return jnp.maximum(y @ hd["w3"] + hd["b3"], 0.0)


# ---------------------------------------------------------------------------
# Deterministic parameter construction (logical / unpadded shapes).
# ---------------------------------------------------------------------------
def _linear(key, d_in, d_out, scale=0.1):
    kw, kb = jax.random.split(key)
    w = scale * jax.random.normal(kw, (d_in, d_out), jnp.float32)
    b = scale * jax.random.normal(kb, (1, d_out), jnp.float32)
    return w, b


def _bn_affine(key, d, bn_eps=1e-5):
    kg, kb, km, kv = jax.random.split(key, 4)
    gamma = 1.0 + 0.1 * jax.random.normal(kg, (1, d), jnp.float32)
    beta = 0.1 * jax.random.normal(kb, (1, d), jnp.float32)
    mean = 0.1 * jax.random.normal(km, (1, d), jnp.float32)
    var = jnp.abs(1.0 + 0.1 * jax.random.normal(kv, (1, d), jnp.float32))
    scale = gamma / jnp.sqrt(var + bn_eps)
    shift = beta - mean * scale
    return scale, shift


def make_gin_block_params(key, d_in, hidden):
    k1, k2, k3, k4 = jax.random.split(key, 4)
    w1, b1 = _linear(k1, d_in, hidden)
    s1, t1 = _bn_affine(k2, hidden)
    w2, b2 = _linear(k3, hidden, hidden)
    s2, t2 = _bn_affine(k4, hidden)
    return dict(w1=w1, b1=b1, s1=s1, t1=t1, w2=w2, b2=b2, s2=s2, t2=t2)


def make_head_params(key, hidden):
    k1, k2, k3 = jax.random.split(key, 3)
    d = hidden * 3
    w1, b1 = _linear(k1, d, d)
    w2, b2 = _linear(k2, d, d)
    w3, b3 = _linear(k3, d, 1)
    return dict(w1=w1, b1=b1, w2=w2, b2=b2, w3=w3, b3=b3)


# ---------------------------------------------------------------------------
if __name__ == "__main__":
    node_features = 8
    hidden_dim = 32
    num_nodes = 16
    num_edges = 40
    eps = 0.0  # GINConv eps (train_eps=False)

    key = jax.random.PRNGKey(0)
    kx, ke, kp1, kp2, kp3, kph = jax.random.split(key, 6)

    x = jax.random.normal(kx, (num_nodes, node_features), jnp.float32)
    edge_index = jax.random.randint(ke, (2, num_edges), 0, num_nodes, jnp.int32)
    batch = jnp.zeros((num_nodes,), jnp.int32)  # unused by the reference forward

    params = dict(
        conv1=make_gin_block_params(kp1, node_features, hidden_dim),
        conv2=make_gin_block_params(kp2, hidden_dim, hidden_dim),
        conv3=make_gin_block_params(kp3, hidden_dim, hidden_dim),
        head=make_head_params(kph, hidden_dim),
    )

    out = gin_conv_net_forward(x, edge_index, params, eps=eps)
    out = jax.block_until_ready(out)
    assert out.shape == (num_nodes, 1) and out.dtype == jnp.float32

    # Tolerance-based check vs. the pure-f32 reference (kernel uses bf16 MXU
    # operands with f32 accumulation, so it is not bit-exact).
    ref = jax.block_until_ready(gin_forward_reference(x, edge_index, params, eps=eps))
    max_err = float(jnp.max(jnp.abs(out - ref)))
    assert max_err < 5e-2, f"max abs error vs reference too large: {max_err}"

    print("KERNEL_OK")
</pallas_src>

<mosaic_0001>
module attributes {stable_mosaic.version = 11 : i64} {
  func.func @fused_gin_kernel(%arg0: memref<128x128xbf16, #tpu.memory_space<vmem>>, %arg1: memref<128x128xf32, #tpu.memory_space<vmem>>, %arg2: memref<3x128x128xbf16, #tpu.memory_space<vmem>>, %arg3: memref<3x1x128xf32, #tpu.memory_space<vmem>>, %arg4: memref<3x128x128xbf16, #tpu.memory_space<vmem>>, %arg5: memref<3x1x128xf32, #tpu.memory_space<vmem>>, %arg6: memref<3x128x128xbf16, #tpu.memory_space<vmem>>, %arg7: memref<1x128xf32, #tpu.memory_space<vmem>>, %arg8: memref<128x128xbf16, #tpu.memory_space<vmem>>, %arg9: memref<1x128xf32, #tpu.memory_space<vmem>>, %arg10: memref<128x128xbf16, #tpu.memory_space<vmem>>, %arg11: memref<1x128xf32, #tpu.memory_space<vmem>>, %arg12: memref<128x128xf32, #tpu.memory_space<vmem>>) attributes {dimension_semantics = [], scalar_prefetch = 0 : i64, scratch_operands = 0 : i64, tpu.core_type = #tpu.core_type<tc>} {
    %c0 = arith.constant 0 : index
    %c0_0 = arith.constant 0 : index
    %0 = vector.load %arg0[%c0, %c0_0] : memref<128x128xbf16, #tpu.memory_space<vmem>>, vector<128x128xbf16>
    %c0_1 = arith.constant 0 : index
    %c0_2 = arith.constant 0 : index
    %1 = vector.load %arg1[%c0_1, %c0_2] : memref<128x128xf32, #tpu.memory_space<vmem>>, vector<128x128xf32>
    %2 = arith.truncf %1 : vector<128x128xf32> to vector<128x128xbf16>
    %cst = arith.constant 0.000000e+00 : f32
    %3 = vector.broadcast %cst : f32 to vector<128x128xf32>
    %cst_3 = arith.constant dense<0.000000e+00> : vector<128x128xf32>
    %4 = tpu.matmul %0, %2, %cst_3 {dimension_numbers = #tpu.dot_dimension_numbers<[1], [0], [0], [1], [0, 0, 1, 1], [], []>} : vector<128x128xbf16>, vector<128x128xbf16>, vector<128x128xf32> -> vector<128x128xf32>
    %5 = arith.truncf %4 : vector<128x128xf32> to vector<128x128xbf16>
    %c0_4 = arith.constant 0 : index
    %c0_5 = arith.constant 0 : index
    %c0_6 = arith.constant 0 : index
    %6 = vector.load %arg2[%c0_4, %c0_5, %c0_6] : memref<3x128x128xbf16, #tpu.memory_space<vmem>>, vector<1x128x128xbf16>
    %7 = vector.shape_cast %6 : vector<1x128x128xbf16> to vector<128x128xbf16>
    %cst_7 = arith.constant dense<0.000000e+00> : vector<128x128xf32>
    %8 = tpu.matmul %5, %7, %cst_7 {dimension_numbers = #tpu.dot_dimension_numbers<[1], [0], [0], [1], [0, 0, 1, 1], [], []>} : vector<128x128xbf16>, vector<128x128xbf16>, vector<128x128xf32> -> vector<128x128xf32>
    %c0_8 = arith.constant 0 : index
    %c0_9 = arith.constant 0 : index
    %c0_10 = arith.constant 0 : index
    %9 = vector.load %arg3[%c0_8, %c0_9, %c0_10] : memref<3x1x128xf32, #tpu.memory_space<vmem>>, vector<1x1x128xf32>
    %10 = vector.shape_cast %9 : vector<1x1x128xf32> to vector<1x128xf32>
    %11 = vector.broadcast %10 : vector<1x128xf32> to vector<128x128xf32>
    %12 = arith.addf %8, %11 : vector<128x128xf32>
    %cst_11 = arith.constant 0.000000e+00 : f32
    %13 = vector.broadcast %cst_11 : f32 to vector<128x128xf32>
    %14 = arith.maximumf %12, %13 : vector<128x128xf32>
    %15 = arith.truncf %14 : vector<128x128xf32> to vector<128x128xbf16>
    %c0_12 = arith.constant 0 : index
    %c0_13 = arith.constant 0 : index
    %c0_14 = arith.constant 0 : index
    %16 = vector.load %arg4[%c0_12, %c0_13, %c0_14] : memref<3x128x128xbf16, #tpu.memory_space<vmem>>, vector<1x128x128xbf16>
    %17 = vector.shape_cast %16 : vector<1x128x128xbf16> to vector<128x128xbf16>
    %cst_15 = arith.constant dense<0.000000e+00> : vector<128x128xf32>
    %18 = tpu.matmul %15, %17, %cst_15 {dimension_numbers = #tpu.dot_dimension_numbers<[1], [0], [0], [1], [0, 0, 1, 1], [], []>} : vector<128x128xbf16>, vector<128x128xbf16>, vector<128x128xf32> -> vector<128x128xf32>
    %c0_16 = arith.constant 0 : index
    %c0_17 = arith.constant 0 : index
    %c0_18 = arith.constant 0 : index
    %19 = vector.load %arg5[%c0_16, %c0_17, %c0_18] : memref<3x1x128xf32, #tpu.memory_space<vmem>>, vector<1x1x128xf32>
    %20 = vector.shape_cast %19 : vector<1x1x128xf32> to vector<1x128xf32>
    %21 = vector.broadcast %20 : vector<1x128xf32> to vector<128x128xf32>
    %22 = arith.addf %18, %21 : vector<128x128xf32>
    %cst_19 = arith.constant 0.000000e+00 : f32
    %23 = vector.broadcast %cst_19 : f32 to vector<128x128xf32>
    %24 = arith.maximumf %22, %23 : vector<128x128xf32>
    %25 = arith.truncf %24 : vector<128x128xf32> to vector<128x128xbf16>
    %c0_20 = arith.constant 0 : index
    %c0_21 = arith.constant 0 : index
    %c0_22 = arith.constant 0 : index
    %26 = vector.load %arg6[%c0_20, %c0_21, %c0_22] : memref<3x128x128xbf16, #tpu.memory_space<vmem>>, vector<1x128x128xbf16>
    %27 = vector.shape_cast %26 : vector<1x128x128xbf16> to vector<128x128xbf16>
    %cst_23 = arith.constant dense<0.000000e+00> : vector<128x128xf32>
    %28 = tpu.matmul %25, %27, %cst_23 {dimension_numbers = #tpu.dot_dimension_numbers<[1], [0], [0], [1], [0, 0, 1, 1], [], []>} : vector<128x128xbf16>, vector<128x128xbf16>, vector<128x128xf32> -> vector<128x128xf32>
    %29 = arith.addf %3, %28 : vector<128x128xf32>
    %cst_24 = arith.constant dense<0.000000e+00> : vector<128x128xf32>
    %30 = tpu.matmul %0, %25, %cst_24 {dimension_numbers = #tpu.dot_dimension_numbers<[1], [0], [0], [1], [0, 0, 1, 1], [], []>} : vector<128x128xbf16>, vector<128x128xbf16>, vector<128x128xf32> -> vector<128x128xf32>
    %31 = arith.truncf %30 : vector<128x128xf32> to vector<128x128xbf16>
    %c1 = arith.constant 1 : index
    %c0_25 = arith.constant 0 : index
    %c0_26 = arith.constant 0 : index
    %32 = vector.load %arg2[%c1, %c0_25, %c0_26] : memref<3x128x128xbf16, #tpu.memory_space<vmem>>, vector<1x128x128xbf16>
    %33 = vector.shape_cast %32 : vector<1x128x128xbf16> to vector<128x128xbf16>
    %cst_27 = arith.constant dense<0.000000e+00> : vector<128x128xf32>
    %34 = tpu.matmul %31, %33, %cst_27 {dimension_numbers = #tpu.dot_dimension_numbers<[1], [0], [0], [1], [0, 0, 1, 1], [], []>} : vector<128x128xbf16>, vector<128x128xbf16>, vector<128x128xf32> -> vector<128x128xf32>
    %c1_28 = arith.constant 1 : index
    %c0_29 = arith.constant 0 : index
    %c0_30 = arith.constant 0 : index
    %35 = vector.load %arg3[%c1_28, %c0_29, %c0_30] : memref<3x1x128xf32, #tpu.memory_space<vmem>>, vector<1x1x128xf32>
    %36 = vector.shape_cast %35 : vector<1x1x128xf32> to vector<1x128xf32>
    %37 = vector.broadcast %36 : vector<1x128xf32> to vector<128x128xf32>
    %38 = arith.addf %34, %37 : vector<128x128xf32>
    %cst_31 = arith.constant 0.000000e+00 : f32
    %39 = vector.broadcast %cst_31 : f32 to vector<128x128xf32>
    %40 = arith.maximumf %38, %39 : vector<128x128xf32>
    %41 = arith.truncf %40 : vector<128x128xf32> to vector<128x128xbf16>
    %c1_32 = arith.constant 1 : index
    %c0_33 = arith.constant 0 : index
    %c0_34 = arith.constant 0 : index
    %42 = vector.load %arg4[%c1_32, %c0_33, %c0_34] : memref<3x128x128xbf16, #tpu.memory_space<vmem>>, vector<1x128x128xbf16>
    %43 = vector.shape_cast %42 : vector<1x128x128xbf16> to vector<128x128xbf16>
    %cst_35 = arith.constant dense<0.000000e+00> : vector<128x128xf32>
    %44 = tpu.matmul %41, %43, %cst_35 {dimension_numbers = #tpu.dot_dimension_numbers<[1], [0], [0], [1], [0, 0, 1, 1], [], []>} : vector<128x128xbf16>, vector<128x128xbf16>, vector<128x128xf32> -> vector<128x128xf32>
    %c1_36 = arith.constant 1 : index
    %c0_37 = arith.constant 0 : index
    %c0_38 = arith.constant 0 : index
    %45 = vector.load %arg5[%c1_36, %c0_37, %c0_38] : memref<3x1x128xf32, #tpu.memory_space<vmem>>, vector<1x1x128xf32>
    %46 = vector.shape_cast %45 : vector<1x1x128xf32> to vector<1x128xf32>
    %47 = vector.broadcast %46 : vector<1x128xf32> to vector<128x128xf32>
    %48 = arith.addf %44, %47 : vector<128x128xf32>
    %cst_39 = arith.constant 0.000000e+00 : f32
    %49 = vector.broadcast %cst_39 : f32 to vector<128x128xf32>
    %50 = arith.maximumf %48, %49 : vector<128x128xf32>
    %51 = arith.truncf %50 : vector<128x128xf32> to vector<128x128xbf16>
    %c1_40 = arith.constant 1 : index
    %c0_41 = arith.constant 0 : index
    %c0_42 = arith.constant 0 : index
    %52 = vector.load %arg6[%c1_40, %c0_41, %c0_42] : memref<3x128x128xbf16, #tpu.memory_space<vmem>>, vector<1x128x128xbf16>
    %53 = vector.shape_cast %52 : vector<1x128x128xbf16> to vector<128x128xbf16>
    %cst_43 = arith.constant dense<0.000000e+00> : vector<128x128xf32>
    %54 = tpu.matmul %51, %53, %cst_43 {dimension_numbers = #tpu.dot_dimension_numbers<[1], [0], [0], [1], [0, 0, 1, 1], [], []>} : vector<128x128xbf16>, vector<128x128xbf16>, vector<128x128xf32> -> vector<128x128xf32>
    %55 = arith.addf %29, %54 : vector<128x128xf32>
    %cst_44 = arith.constant dense<0.000000e+00> : vector<128x128xf32>
    %56 = tpu.matmul %0, %51, %cst_44 {dimension_numbers = #tpu.dot_dimension_numbers<[1], [0], [0], [1], [0, 0, 1, 1], [], []>} : vector<128x128xbf16>, vector<128x128xbf16>, vector<128x128xf32> -> vector<128x128xf32>
    %57 = arith.truncf %56 : vector<128x128xf32> to vector<128x128xbf16>
    %c2 = arith.constant 2 : index
    %c0_45 = arith.constant 0 : index
    %c0_46 = arith.constant 0 : index
    %58 = vector.load %arg2[%c2, %c0_45, %c0_46] : memref<3x128x128xbf16, #tpu.memory_space<vmem>>, vector<1x128x128xbf16>
    %59 = vector.shape_cast %58 : vector<1x128x128xbf16> to vector<128x128xbf16>
    %cst_47 = arith.constant dense<0.000000e+00> : vector<128x128xf32>
    %60 = tpu.matmul %57, %59, %cst_47 {dimension_numbers = #tpu.dot_dimension_numbers<[1], [0], [0], [1], [0, 0, 1, 1], [], []>} : vector<128x128xbf16>, vector<128x128xbf16>, vector<128x128xf32> -> vector<128x128xf32>
    %c2_48 = arith.constant 2 : index
    %c0_49 = arith.constant 0 : index
    %c0_50 = arith.constant 0 : index
    %61 = vector.load %arg3[%c2_48, %c0_49, %c0_50] : memref<3x1x128xf32, #tpu.memory_space<vmem>>, vector<1x1x128xf32>
    %62 = vector.shape_cast %61 : vector<1x1x128xf32> to vector<1x128xf32>
    %63 = vector.broadcast %62 : vector<1x128xf32> to vector<128x128xf32>
    %64 = arith.addf %60, %63 : vector<128x128xf32>
    %cst_51 = arith.constant 0.000000e+00 : f32
    %65 = vector.broadcast %cst_51 : f32 to vector<128x128xf32>
    %66 = arith.maximumf %64, %65 : vector<128x128xf32>
    %67 = arith.truncf %66 : vector<128x128xf32> to vector<128x128xbf16>
    %c2_52 = arith.constant 2 : index
    %c0_53 = arith.constant 0 : index
    %c0_54 = arith.constant 0 : index
    %68 = vector.load %arg4[%c2_52, %c0_53, %c0_54] : memref<3x128x128xbf16, #tpu.memory_space<vmem>>, vector<1x128x128xbf16>
    %69 = vector.shape_cast %68 : vector<1x128x128xbf16> to vector<128x128xbf16>
    %cst_55 = arith.constant dense<0.000000e+00> : vector<128x128xf32>
    %70 = tpu.matmul %67, %69, %cst_55 {dimension_numbers = #tpu.dot_dimension_numbers<[1], [0], [0], [1], [0, 0, 1, 1], [], []>} : vector<128x128xbf16>, vector<128x128xbf16>, vector<128x128xf32> -> vector<128x128xf32>
    %c2_56 = arith.constant 2 : index
    %c0_57 = arith.constant 0 : index
    %c0_58 = arith.constant 0 : index
    %71 = vector.load %arg5[%c2_56, %c0_57, %c0_58] : memref<3x1x128xf32, #tpu.memory_space<vmem>>, vector<1x1x128xf32>
    %72 = vector.shape_cast %71 : vector<1x1x128xf32> to vector<1x128xf32>
    %73 = vector.broadcast %72 : vector<1x128xf32> to vector<128x128xf32>
    %74 = arith.addf %70, %73 : vector<128x128xf32>
    %cst_59 = arith.constant 0.000000e+00 : f32
    %75 = vector.broadcast %cst_59 : f32 to vector<128x128xf32>
    %76 = arith.maximumf %74, %75 : vector<128x128xf32>
    %77 = arith.truncf %76 : vector<128x128xf32> to vector<128x128xbf16>
    %c2_60 = arith.constant 2 : index
    %c0_61 = arith.constant 0 : index
    %c0_62 = arith.constant 0 : index
    %78 = vector.load %arg6[%c2_60, %c0_61, %c0_62] : memref<3x128x128xbf16, #tpu.memory_space<vmem>>, vector<1x128x128xbf16>
    %79 = vector.shape_cast %78 : vector<1x128x128xbf16> to vector<128x128xbf16>
    %cst_63 = arith.constant dense<0.000000e+00> : vector<128x128xf32>
    %80 = tpu.matmul %77, %79, %cst_63 {dimension_numbers = #tpu.dot_dimension_numbers<[1], [0], [0], [1], [0, 0, 1, 1], [], []>} : vector<128x128xbf16>, vector<128x128xbf16>, vector<128x128xf32> -> vector<128x128xf32>
    %81 = arith.addf %55, %80 : vector<128x128xf32>
    %c0_64 = arith.constant 0 : index
    %c0_65 = arith.constant 0 : index
    %82 = vector.load %arg7[%c0_64, %c0_65] : memref<1x128xf32, #tpu.memory_space<vmem>>, vector<1x128xf32>
    %83 = vector.broadcast %82 : vector<1x128xf32> to vector<128x128xf32>
    %84 = arith.addf %81, %83 : vector<128x128xf32>
    %cst_66 = arith.constant 0.000000e+00 : f32
    %85 = vector.broadcast %cst_66 : f32 to vector<128x128xf32>
    %86 = arith.maximumf %84, %85 : vector<128x128xf32>
    %87 = arith.truncf %86 : vector<128x128xf32> to vector<128x128xbf16>
    %c0_67 = arith.constant 0 : index
    %c0_68 = arith.constant 0 : index
    %88 = vector.load %arg8[%c0_67, %c0_68] : memref<128x128xbf16, #tpu.memory_space<vmem>>, vector<128x128xbf16>
    %cst_69 = arith.constant dense<0.000000e+00> : vector<128x128xf32>
    %89 = tpu.matmul %87, %88, %cst_69 {dimension_numbers = #tpu.dot_dimension_numbers<[1], [0], [0], [1], [0, 0, 1, 1], [], []>} : vector<128x128xbf16>, vector<128x128xbf16>, vector<128x128xf32> -> vector<128x128xf32>
    %c0_70 = arith.constant 0 : index
    %c0_71 = arith.constant 0 : index
    %90 = vector.load %arg9[%c0_70, %c0_71] : memref<1x128xf32, #tpu.memory_space<vmem>>, vector<1x128xf32>
    %91 = vector.broadcast %90 : vector<1x128xf32> to vector<128x128xf32>
    %92 = arith.addf %89, %91 : vector<128x128xf32>
    %cst_72 = arith.constant 0.000000e+00 : f32
    %93 = vector.broadcast %cst_72 : f32 to vector<128x128xf32>
    %94 = arith.maximumf %92, %93 : vector<128x128xf32>
    %95 = arith.truncf %94 : vector<128x128xf32> to vector<128x128xbf16>
    %c0_73 = arith.constant 0 : index
    %c0_74 = arith.constant 0 : index
    %96 = vector.load %arg10[%c0_73, %c0_74] : memref<128x128xbf16, #tpu.memory_space<vmem>>, vector<128x128xbf16>
    %cst_75 = arith.constant dense<0.000000e+00> : vector<128x128xf32>
    %97 = tpu.matmul %95, %96, %cst_75 {dimension_numbers = #tpu.dot_dimension_numbers<[1], [0], [0], [1], [0, 0, 1, 1], [], []>} : vector<128x128xbf16>, vector<128x128xbf16>, vector<128x128xf32> -> vector<128x128xf32>
    %c0_76 = arith.constant 0 : index
    %c0_77 = arith.constant 0 : index
    %98 = vector.load %arg11[%c0_76, %c0_77] : memref<1x128xf32, #tpu.memory_space<vmem>>, vector<1x128xf32>
    %99 = vector.broadcast %98 : vector<1x128xf32> to vector<128x128xf32>
    %100 = arith.addf %97, %99 : vector<128x128xf32>
    %cst_78 = arith.constant 0.000000e+00 : f32
    %101 = vector.broadcast %cst_78 : f32 to vector<128x128xf32>
    %102 = arith.maximumf %100, %101 : vector<128x128xf32>
    %c0_79 = arith.constant 0 : index
    %c0_80 = arith.constant 0 : index
    %103 = vector.load %arg12[%c0_79, %c0_80] : memref<128x128xf32, #tpu.memory_space<vmem>>, vector<128x128xf32>
    tpu.vector_store %arg12[%c0_79, %c0_80], %102 {strides = array<i32>} : memref<128x128xf32, #tpu.memory_space<vmem>>, vector<128x128xf32>,
    return
  }
}

</mosaic_0001>

<bundles_post_ra>
// kernel: tpu_custom_call.1
= control target key start
LH: loop header
LB: loop body
LE: loop exit
PB: predicated region body
PF: predicated region fallthrough
CT: control target
= control target key end

     0   :  { %17 = vsyncpa [#allocation3], 0  ;;  %s4112_s0 = inlined_call_operand.hbm [shape: bf16[128,128], index: 0, kind: input, shape index: {}]   ;;  %s4113_s1 = inlined_call_operand.hbm [shape: f32[128,128], index: 1, kind: input, shape index: {}]   ;;  %s4114_s2 = inlined_call_operand.hbm [shape: bf16[3,128,128], index: 2, kind: input, shape index: {}]   ;;  %s4115_s3 = inlined_call_operand.vmem [shape: f32[3,1,128], index: 3, kind: input, shape index: {}]   ;;  %s4116_s4 = inlined_call_operand.hbm [shape: bf16[3,128,128], index: 4, kind: input, shape index: {}]   ;;  %s4117_s5 = inlined_call_operand.vmem [shape: f32[3,1,128], index: 5, kind: input, shape index: {}]   ;;  %s4118_s6 = inlined_call_operand.hbm [shape: bf16[3,128,128], index: 6, kind: input, shape index: {}]   ;;  %s4119_s7 = inlined_call_operand.vmem [shape: f32[1,128], index: 7, kind: input, shape index: {}]   ;;  %s4120_s8 = inlined_call_operand.hbm [shape: bf16[128,128], index: 8, kind: input, shape index: {}]   ;;  %s4121_s9 = inlined_call_operand.vmem [shape: f32[1,128], index: 9, kind: input, shape index: {}]   ;;  %s4122_s10 = inlined_call_operand.hbm [shape: bf16[128,128], index: 10, kind: input, shape index: {}]   ;;  %s4123_s11 = inlined_call_operand.vmem [shape: f32[1,128], index: 11, kind: input, shape index: {}]   ;;  %s4124_s12 = inlined_call_operand.hbm [shape: f32[128,128], index: 12, kind: output, shape index: {}]  }
   0x1   :  { %18 = vsyncpa [#allocation6], 0 }
   0x2   :  { %19 = vsyncpa [#allocation9], 0 }
   0x3   :  { %20 = vsyncpa [#allocation12], 0 }
   0x4   :  { %21 = vsyncpa [#allocation4], 0  ;;  %s3728_s21 = smov [#allocation5]  }
   0x5   :  { %s39_s22 = sshll.u32 %s3728_s21, 4  ;;  %s40_s22 = int_to_ptr.vmem [resolvable:$true] %s39_s22 }
   0x6   :  { %s3566_s23 = scalar_lea.vmem %s40_s22, 2048  ;;  %p3571_p1 = scmp.lt.s32.totalorder %s40_s22, %s40_s22 }
   0x7   :  { %p3567_p0 = scmp.ne.s32.totalorder %s40_s22, %s3566_s23  ;;  %p3572_p2 = scmp.lt.s32.totalorder %s3566_s23, %s3566_s23 }
   0x9   :  { %p3573_p3 = por %p3572_p2, %p3571_p1 }
   0xb   :  { %p3574_p4 = pnand %p3573_p3, %p3567_p0 }
   0xd   :  { %3577 = shalt.err (!%p3574_p4)
}
   0xe   :  { %s3729_s24 = smov 128   ;;  %s3730_s25 = smov 8  }
   0xf   :  { %45 = dma.hbm_to_vmem [thread:$0]  %s4113_s1, 2048, %s40_s22, [#allocation6], %s3729_s24, %s3729_s24, %s3730_s25  }
  0x10   :  { %s3731_s28 = smov [#allocation8]   ;;  %s3732_s30 = smov [#allocation11]  }
  0x11   :  { %s65_s29 = sshll.u32 %s3731_s28, 4  ;;  %s93_s13 = sshll.u32 %s3732_s30, 4  ;;  %s66_s29 = int_to_ptr.vmem [resolvable:$true] %s65_s29  ;;  %s94_s13 = int_to_ptr.vmem [resolvable:$true] %s93_s13 }
  0x12   :  { %s3586_s14 = scalar_lea.vmem %s66_s29, 3072  ;;  %p3591_p6 = scmp.lt.s32.totalorder %s66_s29, %s66_s29 }
  0x13   :  { %p3587_p5 = scmp.ne.s32.totalorder %s66_s29, %s3586_s14  ;;  %p3592_p7 = scmp.lt.s32.totalorder %s3586_s14, %s3586_s14 }
  0x15   :  { %p3593_p8 = por %p3592_p7, %p3591_p6 }
  0x17   :  { %p3594_p9 = pnand %p3593_p8, %p3587_p5 }
  0x19   :  { %3597 = shalt.err (!%p3594_p9)
}
  0x1a   :  { %s3733_s15 = smov 64   ;;  %s3734_s16 = smov 4  }
  0x1b   :  { %71 = dma.hbm_to_vmem [thread:$0]  %s4116_s4, 3072, %s66_s29, [#allocation9], %s3733_s15, %s3733_s15, %s3734_s16  }
  0x1c   :  { %s3606_s1 = scalar_lea.vmem %s94_s13, 1024  ;;  %p3611_p11 = scmp.lt.s32.totalorder %s94_s13, %s94_s13 }
  0x1d   :  { %p3607_p10 = scmp.ne.s32.totalorder %s94_s13, %s3606_s1  ;;  %p3612_p12 = scmp.lt.s32.totalorder %s3606_s1, %s3606_s1 }
  0x1f   :  { %p3613_p13 = por %p3612_p12, %p3611_p11 }
  0x21   :  { %p3614_p0 = pnand %p3613_p13, %p3607_p10 }
  0x23   :  { %3617 = shalt.err (!%p3614_p0)
}
  0x24   :  { %99 = dma.hbm_to_vmem [thread:$0]  %s4120_s8, 1024, %s94_s13, [#allocation12], %s3733_s15, %s3733_s15, %s3734_s16  }
  0x25   :  { %s3735_s21 = smov [#allocation2]   ;;  %s3736_s23 = smov [#allocation7]  }
  0x26   :  { %s27_s22 = sshll.u32 %s3735_s21, 4  ;;  %s51_s4 = sshll.u32 %s3736_s23, 4  ;;  %s28_s22 = int_to_ptr.vmem [resolvable:$true] %s27_s22  ;;  %s52_s4 = int_to_ptr.vmem [resolvable:$true] %s51_s4 }
  0x27   :  { %s3626_s26 = scalar_lea.vmem %s28_s22, 1024  ;;  %p3631_p2 = scmp.lt.s32.totalorder %s28_s22, %s28_s22 }
  0x28   :  { %p3627_p1 = scmp.ne.s32.totalorder %s28_s22, %s3626_s26  ;;  %p3632_p3 = scmp.lt.s32.totalorder %s3626_s26, %s3626_s26 }
  0x2a   :  { %p3633_p4 = por %p3632_p3, %p3631_p2 }
  0x2c   :  { %p3634_p5 = pnand %p3633_p4, %p3627_p1 }
  0x2e   :  { %3637 = shalt.err (!%p3634_p5)
}
  0x2f   :  { %33 = dma.hbm_to_vmem [thread:$0]  %s4112_s0, 1024, %s28_s22, [#allocation3], %s3733_s15, %s3733_s15, %s3734_s16  }
  0x30   :  { %s3646_s8 = scalar_lea.vmem %s52_s4, 3072  ;;  %p3651_p7 = scmp.lt.s32.totalorder %s52_s4, %s52_s4 }
  0x31   :  { %p3647_p6 = scmp.ne.s32.totalorder %s52_s4, %s3646_s8  ;;  %p3652_p8 = scmp.lt.s32.totalorder %s3646_s8, %s3646_s8 }
  0x33   :  { %p3653_p9 = por %p3652_p8, %p3651_p7 }
  0x35   :  { %p3654_p10 = pnand %p3653_p9, %p3647_p6 }
  0x37   :  { %3657 = shalt.err (!%p3654_p10)
}
  0x38   :  { %57 = dma.hbm_to_vmem [thread:$0]  %s4114_s2, 3072, %s52_s4, [#allocation6], %s3733_s15, %s3733_s15, %s3734_s16  }
  0x39   :  { %s3737_s13 = smov [#allocation10]   ;;  %s3738_s17 = smov [#allocation13]  }
  0x3a   :  { %s79_s14 = sshll.u32 %s3737_s13, 4  ;;  %s107_s0 = sshll.u32 %s3738_s17, 4  ;;  %s80_s14 = int_to_ptr.vmem [resolvable:$true] %s79_s14  ;;  %s108_s0 = int_to_ptr.vmem [resolvable:$true] %s107_s0 }
  0x3b   :  { %s3666_s18 = scalar_lea.vmem %s80_s14, 3072  ;;  %p3671_p12 = scmp.lt.s32.totalorder %s80_s14, %s80_s14 }
  0x3c   :  { %p3667_p11 = scmp.ne.s32.totalorder %s80_s14, %s3666_s18  ;;  %p3672_p13 = scmp.lt.s32.totalorder %s3666_s18, %s3666_s18 }
  0x3e   :  { %p3673_p0 = por %p3672_p13, %p3671_p12 }
  0x40   :  { %p3674_p1 = pnand %p3673_p0, %p3667_p11 }
  0x42   :  { %3677 = shalt.err (!%p3674_p1)
}
  0x43   :  { %85 = dma.hbm_to_vmem [thread:$0]  %s4118_s6, 3072, %s80_s14, [#allocation9], %s3733_s15, %s3733_s15, %s3734_s16  }
  0x44   :  { %s3686_s2 = scalar_lea.vmem %s108_s0, 1024  ;;  %p3691_p3 = scmp.lt.s32.totalorder %s108_s0, %s108_s0 }
  0x45   :  { %p3687_p2 = scmp.ne.s32.totalorder %s108_s0, %s3686_s2  ;;  %p3692_p4 = scmp.lt.s32.totalorder %s3686_s2, %s3686_s2 }
  0x47   :  { %p3693_p5 = por %p3692_p4, %p3691_p3 }
  0x49   :  { %p3694_p6 = pnand %p3693_p5, %p3687_p2 }
  0x4b   :  { %3697 = shalt.err (!%p3694_p6)
}
  0x4c   :  { %113 = dma.hbm_to_vmem [thread:$0]  %s4122_s10, 1024, %s108_s0, [#allocation12], %s3733_s15, %s3733_s15, %s3734_s16  }
  0x4d   :  { %3718 = dma.done.wait [#allocation3], 1024  }
  0x4e   :  { %3719 = vsyncadd [#allocation3], 4294966272 }
  0x4f   :  { %3720 = dma.done.wait [#allocation6], 5120  }
  0x50   :  { %3721 = vsyncadd [#allocation6], 4294962176 }
  0x51   :  { %3722 = dma.done.wait [#allocation9], 6144  }
  0x52   :  { %3723 = vsyncadd [#allocation9], 4294961152 }
  0x53   :  { %3724 = dma.done.wait [#allocation12], 2048  }
  0x54   :  { %3725 = vsyncadd [#allocation12], 4294965248  ;;  %v168_v0 = vld [vmem:[#allocation5 + $0x70] sm:$0xff]  ;;  %v169_v1 = vld [vmem:[#allocation5 + $0x78] sm:$0xff] }
  0x55   :  { %v166_v2 = vld [vmem:[#allocation5 + $0x60] sm:$0xff]  ;;  %v177_v3 = vpack.c.bf16 %v169_v1, %v168_v0  ;;  %v167_v4 = vld [vmem:[#allocation5 + $0x68] sm:$0xff]  ;;  %v164_v6 = vld [vmem:[#allocation5 + $0x50] sm:$0xff] }
  0x56   :  { %v176_v5 = vpack.c.bf16 %v167_v4, %v166_v2  ;;  %v165_v7 = vld [vmem:[#allocation5 + $0x58] sm:$0xff]  ;;  %v162_v8 = vld [vmem:[#allocation5 + $0x40] sm:$0xff]  ;;  %v163_v10 = vld [vmem:[#allocation5 + $0x48] sm:$0xff] }
  0x57   :  { %2994 = vmatprep.subr.bf16.mxu0 %v177_v3  ;;  %v175_v9 = vpack.c.bf16 %v165_v7, %v164_v6  ;;  %v3847_v11 = vld [vmem:[#allocation2] sm:$0xff]   ;;  %v174_v12 = vpack.c.bf16 %v163_v10, %v162_v8  ;;  %v160_v13 = vld [vmem:[#allocation5 + $0x30] sm:$0xff]  ;;  %v161_v14 = vld [vmem:[#allocation5 + $0x38] sm:$0xff] }
  0x58   :  { %2995 = vmatpush3.bf16.msra.mxu0 %v177_v3  ;;  %3010 = vmatprep.mubr.bf16.mxu0 %v3847_v11  ;;  %v158_v15 = vld [vmem:[#allocation5 + $0x20] sm:$0xff]  ;;  %v173_v16 = vpack.c.bf16 %v161_v14, %v160_v13  ;;  %v159_v17 = vld [vmem:[#allocation5 + $0x28] sm:$0xff]  ;;  %v3462_v18 = vld [vmem:[#allocation7 + $0x38] sm:$0xff]  }
  0x59   :  { %2996 = vmatprep.subr.bf16.mxu0 %v176_v5  ;;  %v3463_v19 = vld [vmem:[#allocation7 + $0x30] sm:$0xff]   ;;  %3026 = vmatprep.subr.bf16.mxu1 %v3462_v18  ;;  %v172_v21 = vpack.c.bf16 %v159_v17, %v158_v15  ;;  %v157_v22 = vld [vmem:[#allocation5 + $0x18] sm:$0xff]  ;;  %v3464_v23 = vld [vmem:[#allocation7 + $0x28] sm:$0xff]  }
  0x5a   :  { %v156_v20 = vld [vmem:[#allocation5 + $0x10] sm:$0xff]  ;;  %3027 = vmatpush3.bf16.msra.mxu1 %v3462_v18  ;;  %v154_v24 = vld [vmem:[#allocation5] sm:$0xff]  ;;  %v155_v25 = vld [vmem:[#allocation5 + $0x8] sm:$0xff] }
  0x5b   :  { %3028 = vmatprep.subr.bf16.mxu1 %v3463_v19  ;;  %v3465_v26 = vld [vmem:[#allocation7 + $0x20] sm:$0xff]   ;;  %v171_v27 = vpack.c.bf16 %v157_v22, %v156_v20  ;;  %v3466_v28 = vld [vmem:[#allocation7 + $0x18] sm:$0xff]   ;;  %v170_v29 = vpack.c.bf16 %v155_v25, %v154_v24  ;;  %v3467_v30 = vld [vmem:[#allocation7 + $0x10] sm:$0xff]  }
  0x5c   :  { %2997 = vmatpush3.bf16.msra.mxu0 %v176_v5  ;;  %v3850_v31 = vld [vmem:[#allocation2 + $0x8] sm:$0xff]   ;;  %v3852_v32 = vld [vmem:[#allocation2 + $0x10] sm:$0xff]   ;;  %v3856_v33 = vld [vmem:[#allocation2 + $0x18] sm:$0xff]  }
  0x5d   :  { %2998 = vmatprep.subr.bf16.mxu0 %v175_v9  ;;  %v3858_v34 = vld [vmem:[#allocation2 + $0x20] sm:$0xff]   ;;  %v3862_v35 = vld [vmem:[#allocation2 + $0x28] sm:$0xff]   ;;  %v3864_v36 = vld [vmem:[#allocation2 + $0x30] sm:$0xff]  }
  0x5e   :  { %3029 = vmatpush3.bf16.msra.mxu1 %v3463_v19  ;;  %v3868_v37 = vld [vmem:[#allocation2 + $0x38] sm:$0xff]   ;;  %v3468_v38 = vld [vmem:[#allocation7 + $0x8] sm:$0xff]   ;;  %v3469_v39 = vld [vmem:[#allocation7] sm:$0xff]  }
  0x5f   :  { %3030 = vmatprep.subr.bf16.mxu1 %v3464_v23  ;;  %v3470_v40 = vld [vmem:[#allocation8 + $0x38] sm:$0xff]   ;;  %v3471_v41 = vld [vmem:[#allocation8 + $0x30] sm:$0xff]   ;;  %v3472_v42 = vld [vmem:[#allocation8 + $0x28] sm:$0xff]  }
  0x60   :  { %2999 = vmatpush3.bf16.msra.mxu0 %v175_v9  ;;  %v3473_v43 = vld [vmem:[#allocation8 + $0x20] sm:$0xff]   ;;  %v3474_v44 = vld [vmem:[#allocation8 + $0x18] sm:$0xff]   ;;  %v3475_v5 = vld [vmem:[#allocation8 + $0x10] sm:$0xff]  }
  0x61   :  { %3000 = vmatprep.subr.bf16.mxu0 %v174_v12  ;;  %v3476_v6 = vld [vmem:[#allocation8 + $0x8] sm:$0xff]   ;;  %v3477_v7 = vld [vmem:[#allocation8] sm:$0xff]  }
  0x62   :  { %3031 = vmatpush3.bf16.msra.mxu1 %v3464_v23  ;;  %v2669_v10 = vld [vmem:[%s4115_s3] ss:$0 sm:$0xff] }
  0x63   :  { %3032 = vmatprep.subr.bf16.mxu1 %v3465_v26 }
  0x64   :  { %3001 = vmatpush3.bf16.msra.mxu0 %v174_v12 }
  0x65   :  { %3002 = vmatprep.subr.bf16.mxu0 %v173_v16 }
  0x66   :  { %3033 = vmatpush3.bf16.msra.mxu1 %v3465_v26 }
  0x67   :  { %3034 = vmatprep.subr.bf16.mxu1 %v3466_v28 }
  0x68   :  { %3003 = vmatpush3.bf16.msra.mxu0 %v173_v16 }
  0x69   :  { %3004 = vmatprep.subr.bf16.mxu0 %v172_v21 }
  0x6a   :  { %3035 = vmatpush3.bf16.msra.mxu1 %v3466_v28 }
  0x6b   :  { %3036 = vmatprep.subr.bf16.mxu1 %v3467_v30 }
  0x6c   :  { %3005 = vmatpush3.bf16.msra.mxu0 %v172_v21 }
  0x6d   :  { %3006 = vmatprep.subr.bf16.mxu0 %v171_v27 }
  0x6e   :  { %3037 = vmatpush3.bf16.msra.mxu1 %v3467_v30 }
  0x6f   :  { %3038 = vmatprep.subr.bf16.mxu1 %v3468_v38 }
  0x70   :  { %3007 = vmatpush3.bf16.msra.mxu0 %v171_v27 }
  0x71   :  { %3008 = vmatprep.subr.bf16.mxu0 %v170_v29 }
  0x72   :  { %3039 = vmatpush3.bf16.msra.mxu1 %v3468_v38 }
  0x73   :  { %3040 = vmatprep.subr.bf16.mxu1 %v3469_v39 }
  0x74   :  { %3009 = vmatpush3.bf16.msra.mxu0 %v170_v29 }
  0x75   :  { %3058 = vmatprep.subr.bf16.mxu0 %v3470_v40 }
  0x76   :  { %3041 = vmatpush3.bf16.msra.mxu1 %v3469_v39 }
  0x77   :  { %3011 = vmatmul.mubr.bf16.vlgmr.msra.gmra.mxu0 %v3850_v31 }
  0x78   :  { %3014 = vmatprep.mubr.bf16.mxu0 %v3852_v32  ;;  %3059 = vmatpush3.bf16.msra.mxu0 %v3470_v40 }
  0x79   :  { %3060 = vmatprep.subr.bf16.mxu0 %v3471_v41 }
  0x7c   :  { %3061 = vmatpush3.bf16.msra.mxu0 %v3471_v41 }
  0x7d   :  { %3062 = vmatprep.subr.bf16.mxu0 %v3472_v42 }
  0x7f   :  { %3015 = vmatmul.mubr.bf16.gmra.mxu0 %v3856_v33 }
  0x80   :  { %3018 = vmatprep.mubr.bf16.mxu0 %v3858_v34  ;;  %3063 = vmatpush3.bf16.msra.mxu0 %v3472_v42 }
  0x81   :  { %3064 = vmatprep.subr.bf16.mxu0 %v3473_v43 }
  0x84   :  { %3065 = vmatpush3.bf16.msra.mxu0 %v3473_v43 }
  0x85   :  { %3066 = vmatprep.subr.bf16.mxu0 %v3474_v44 }
  0x87   :  { %3019 = vmatmul.mubr.bf16.gmra.mxu0 %v3862_v35 }
  0x88   :  { %3022 = vmatprep.mubr.bf16.mxu0 %v3864_v36  ;;  %3067 = vmatpush3.bf16.msra.mxu0 %v3474_v44 }
  0x89   :  { %3068 = vmatprep.subr.bf16.mxu0 %v3475_v5 }
  0x8c   :  { %3069 = vmatpush3.bf16.msra.mxu0 %v3475_v5 }
  0x8d   :  { %3070 = vmatprep.subr.bf16.mxu0 %v3476_v6 }
  0x8f   :  { %3023 = vmatmul.mubr.bf16.gmra.mxu0 %v3868_v37 }
  0x90   :  { %3071 = vmatpush3.bf16.msra.mxu0 %v3476_v6 }
  0x91   :  { %3072 = vmatprep.subr.bf16.mxu0 %v3477_v7 }
  0x94   :  { %3073 = vmatpush3.bf16.msra.mxu0 %v3477_v7 }
 0x137   :  { %v3012_v45 = vpop.f32.mrf.mxu0 }
 0x139   :  { %v260_v46 = vpop.f32.mrf.mxu0 }
 0x13b   :  { %v3013_v47 = vpop.f32.mrf.mxu0 }
 0x13c   :  { %v324_v50 = vpack.c.bf16 %v3013_v47, %v3012_v45 }
 0x13d   :  { %v263_v48 = vpop.f32.mrf.mxu0 }
 0x13e   :  { %v323_v49 = vpack.c.bf16 %v263_v48, %v260_v46 }
 0x13f   :  { %v3016_v51 = vpop.f32.mrf.mxu0 }
 0x140   :  { %3042 = vmatprep.mubr.bf16.mxu1 %v323_v49 }
 0x141   :  { %v276_v52 = vpop.f32.mrf.mxu0  ;;  %3043 = vmatmul.mubr.bf16.vlgmr.msra.gmra.mxu1 %v324_v50 }
 0x143   :  { %v3017_v53 = vpop.f32.mrf.mxu0 }
 0x144   :  { %v326_v56 = vpack.c.bf16 %v3017_v53, %v3016_v51 }
 0x145   :  { %v279_v54 = vpop.f32.mrf.mxu0 }
 0x146   :  { %v325_v55 = vpack.c.bf16 %v279_v54, %v276_v52 }
 0x147   :  { %v3020_v57 = vpop.f32.mrf.mxu0 }
 0x148   :  { %3046 = vmatprep.mubr.bf16.mxu1 %v325_v55 }
 0x149   :  { %v292_v58 = vpop.f32.mrf.mxu0  ;;  %3047 = vmatmul.mubr.bf16.gmra.mxu1 %v326_v56 }
 0x14b   :  { %v3021_v59 = vpop.f32.mrf.mxu0 }
 0x14c   :  { %v328_v62 = vpack.c.bf16 %v3021_v59, %v3020_v57 }
 0x14d   :  { %v295_v60 = vpop.f32.mrf.mxu0 }
 0x14e   :  { %v327_v61 = vpack.c.bf16 %v295_v60, %v292_v58 }
 0x14f   :  { %v3024_v63 = vpop.f32.mrf.mxu0 }
 0x150   :  { %3050 = vmatprep.mubr.bf16.mxu1 %v327_v61 }
 0x151   :  { %v308_v0 = vpop.f32.mrf.mxu0  ;;  %3051 = vmatmul.mubr.bf16.gmra.mxu1 %v328_v62 }
 0x153   :  { %v3025_v1 = vpop.f32.mrf.mxu0 }
 0x154   :  { %v330_v4 = vpack.c.bf16 %v3025_v1, %v3024_v63 }
 0x155   :  { %v311_v2 = vpop.f32.mrf.mxu0 }
 0x156   :  { %v329_v3 = vpack.c.bf16 %v311_v2, %v308_v0 }
 0x158   :  { %3054 = vmatprep.mubr.bf16.mxu1 %v329_v3 }
 0x159   :  { %3055 = vmatmul.mubr.bf16.gmra.mxu1 %v330_v4 }
 0x15a   :  { %3106 = vmatprep.mubr.bf16.mxu1 %v3847_v11 }
 0x201   :  { %v3044_v8 = vpop.f32.mrf.mxu1 }
 0x202   :  { %v445_v15 = vadd.f32 %v3044_v8, %v2669_v10  ;;  %v3478_v8 = vld [vmem:[#allocation7 + $0x78] sm:$0xff]  }
 0x203   :  { %v436_v9 = vpop.f32.mrf.mxu1  ;;  %3122 = vmatprep.subr.bf16.mxu0 %v3478_v8 }
 0x204   :  { %v437_v13 = vadd.f32 %v2669_v10, %v436_v9  ;;  %v501_v21 = vmax.f32 %v445_v15, 0.0  ;;  %v3479_v9 = vld [vmem:[#allocation7 + $0x70] sm:$0xff]  }
 0x205   :  { %v3045_v12 = vpop.f32.mrf.mxu1 }
 0x206   :  { %v448_v14 = vadd.f32 %v3045_v12, %v2669_v10  ;;  %v499_v19 = vmax.f32 %v437_v13, 0.0  ;;  %v3480_v12 = vld [vmem:[#allocation7 + $0x68] sm:$0xff]   ;;  %v3481_v13 = vld [vmem:[#allocation7 + $0x60] sm:$0xff]  }
 0x207   :  { %v439_v11 = vpop.f32.mrf.mxu1 }
 0x208   :  { %v440_v16 = vadd.f32 %v2669_v10, %v439_v11  ;;  %v502_v17 = vmax.f32 %v448_v14, 0.0  ;;  %v3483_v14 = vld [vmem:[#allocation7 + $0x50] sm:$0xff]  }
 0x209   :  { %v3048_v18 = vpop.f32.mrf.mxu1 }
 0x20a   :  { %v500_v20 = vmax.f32 %v440_v16, 0.0  ;;  %v516_v24 = vpack.c.bf16 %v502_v17, %v501_v21  ;;  %v461_v28 = vadd.f32 %v3048_v18, %v2669_v10 }
 0x20b   :  { %v452_v22 = vpop.f32.mrf.mxu1 }
 0x20c   :  { %v515_v23 = vpack.c.bf16 %v500_v20, %v499_v19  ;;  %v453_v26 = vadd.f32 %v2669_v10, %v452_v22  ;;  %v505_v42 = vmax.f32 %v461_v28, 0.0 }
 0x20d   :  { %v3049_v25 = vpop.f32.mrf.mxu1 }
 0x20e   :  { %v464_v27 = vadd.f32 %v3049_v25, %v2669_v10  ;;  %3074 = vmatprep.mubr.bf16.mxu0 %v515_v23  ;;  %v503_v40 = vmax.f32 %v453_v26, 0.0 }
 0x20f   :  { %v455_v29 = vpop.f32.mrf.mxu1  ;;  %3075 = vmatmul.mubr.bf16.vlgmr.msra.gmra.mxu0 %v516_v24 }
 0x210   :  { %v456_v30 = vadd.f32 %v2669_v10, %v455_v29  ;;  %v506_v38 = vmax.f32 %v464_v27, 0.0  ;;  %3123 = vmatpush3.bf16.msra.mxu0 %v3478_v8  ;;  %v2678_v27 = vld [vmem:[%s4117_s5] ss:$0 sm:$0xff] }
 0x211   :  { %v3052_v39 = vpop.f32.mrf.mxu1  ;;  %3124 = vmatprep.subr.bf16.mxu0 %v3479_v9 }
 0x212   :  { %v504_v41 = vmax.f32 %v456_v30, 0.0  ;;  %v518_v45 = vpack.c.bf16 %v506_v38, %v505_v42  ;;  %v477_v49 = vadd.f32 %v3052_v39, %v2669_v10 }
 0x213   :  { %v468_v43 = vpop.f32.mrf.mxu1 }
 0x214   :  { %v517_v44 = vpack.c.bf16 %v504_v41, %v503_v40  ;;  %v469_v47 = vadd.f32 %v2669_v10, %v468_v43  ;;  %v509_v56 = vmax.f32 %v477_v49, 0.0  ;;  %3125 = vmatpush3.bf16.msra.mxu0 %v3479_v9 }
 0x215   :  { %v3053_v46 = vpop.f32.mrf.mxu1  ;;  %3126 = vmatprep.subr.bf16.mxu0 %v3480_v12 }
 0x216   :  { %v480_v48 = vadd.f32 %v3053_v46, %v2669_v10  ;;  %3078 = vmatprep.mubr.bf16.mxu0 %v517_v44  ;;  %v507_v54 = vmax.f32 %v469_v47, 0.0 }
 0x217   :  { %v471_v50 = vpop.f32.mrf.mxu1  ;;  %3079 = vmatmul.mubr.bf16.gmra.mxu0 %v518_v45 }
 0x218   :  { %v472_v51 = vadd.f32 %v2669_v10, %v471_v50  ;;  %v510_v52 = vmax.f32 %v480_v48, 0.0  ;;  %3127 = vmatpush3.bf16.msra.mxu0 %v3480_v12 }
 0x219   :  { %v3056_v53 = vpop.f32.mrf.mxu1  ;;  %3128 = vmatprep.subr.bf16.mxu0 %v3481_v13 }
 0x21a   :  { %v508_v55 = vmax.f32 %v472_v51, 0.0  ;;  %v520_v59 = vpack.c.bf16 %v510_v52, %v509_v56  ;;  %v493_v63 = vadd.f32 %v3056_v53, %v2669_v10 }
 0x21b   :  { %v484_v57 = vpop.f32.mrf.mxu1 }
 0x21c   :  { %v519_v58 = vpack.c.bf16 %v508_v55, %v507_v54  ;;  %v485_v61 = vadd.f32 %v2669_v10, %v484_v57  ;;  %v513_v5 = vmax.f32 %v493_v63, 0.0  ;;  %3129 = vmatpush3.bf16.msra.mxu0 %v3481_v13 }
 0x21d   :  { %v3057_v60 = vpop.f32.mrf.mxu1 }
 0x21e   :  { %v496_v62 = vadd.f32 %v3057_v60, %v2669_v10  ;;  %3082 = vmatprep.mubr.bf16.mxu0 %v519_v58  ;;  %v511_v3 = vmax.f32 %v485_v61, 0.0 }
 0x21f   :  { %v487_v0 = vpop.f32.mrf.mxu1  ;;  %3083 = vmatmul.mubr.bf16.gmra.mxu0 %v520_v59 }
 0x220   :  { %v488_v1 = vadd.f32 %v2669_v10, %v487_v0  ;;  %v514_v2 = vmax.f32 %v496_v62, 0.0  ;;  %v3482_v10 = vld [vmem:[#allocation7 + $0x58] sm:$0xff]  }
 0x221   :  { %3130 = vmatprep.subr.bf16.mxu0 %v3482_v10 }
 0x222   :  { %v512_v4 = vmax.f32 %v488_v1, 0.0  ;;  %v522_v7 = vpack.c.bf16 %v514_v2, %v513_v5  ;;  %3131 = vmatpush3.bf16.msra.mxu0 %v3482_v10 }
 0x223   :  { %3132 = vmatprep.subr.bf16.mxu0 %v3483_v14 }
 0x224   :  { %v521_v6 = vpack.c.bf16 %v512_v4, %v511_v3 }
 0x226   :  { %3086 = vmatprep.mubr.bf16.mxu0 %v521_v6  ;;  %3133 = vmatpush3.bf16.msra.mxu0 %v3483_v14 }
 0x227   :  { %3087 = vmatmul.mubr.bf16.gmra.mxu0 %v522_v7 }
 0x2cf   :  { %v3076_v15 = vpop.f32.mrf.mxu0 }
 0x2d0   :  { %v637_v3 = vadd.f32 %v3076_v15, %v2678_v27  ;;  %v3484_v15 = vld [vmem:[#allocation7 + $0x48] sm:$0xff]  }
 0x2d1   :  { %v628_v11 = vpop.f32.mrf.mxu0  ;;  %3134 = vmatprep.subr.bf16.mxu0 %v3484_v15 }
 0x2d2   :  { %v693_v8 = vmax.f32 %v637_v3, 0.0  ;;  %v629_v9 = vadd.f32 %v2678_v27, %v628_v11  ;;  %3135 = vmatpush3.bf16.msra.mxu0 %v3484_v15  ;;  %v3485_v11 = vld [vmem:[#allocation7 + $0x40] sm:$0xff]  }
 0x2d3   :  { %v3077_v16 = vpop.f32.mrf.mxu0  ;;  %3136 = vmatprep.subr.bf16.mxu0 %v3485_v11 }
 0x2d4   :  { %v640_v0 = vadd.f32 %v3077_v16, %v2678_v27  ;;  %v691_v10 = vmax.f32 %v629_v9, 0.0  ;;  %v3486_v16 = vld [vmem:[#allocation8 + $0x78] sm:$0xff]  }
 0x2d5   :  { %v631_v17 = vpop.f32.mrf.mxu0 }
 0x2d6   :  { %v694_v5 = vmax.f32 %v640_v0, 0.0  ;;  %v632_v6 = vadd.f32 %v2678_v27, %v631_v17  ;;  %3137 = vmatpush3.bf16.msra.mxu0 %v3485_v11 }
 0x2d7   :  { %v3080_v18 = vpop.f32.mrf.mxu0 }
 0x2d8   :  { %v653_v57 = vadd.f32 %v3080_v18, %v2678_v27  ;;  %v3901_v12 = vpack.c.bf16 %v694_v5, %v693_v8  ;;  %v692_v13 = vmax.f32 %v632_v6, 0.0 }
 0x2d9   :  { %v644_v19 = vpop.f32.mrf.mxu0 }
 0x2da   :  { %v697_v62 = vmax.f32 %v653_v57, 0.0  ;;  %v645_v63 = vadd.f32 %v2678_v27, %v644_v19  ;;  %v3905_v14 = vpack.c.bf16 %v692_v13, %v691_v10 }
 0x2db   :  { %v3081_v20 = vpop.f32.mrf.mxu0 }
 0x2dc   :  { %v656_v54 = vadd.f32 %v3081_v20, %v2678_v27  ;;  %v695_v4 = vmax.f32 %v645_v63, 0.0 }
 0x2dd   :  { %v647_v21 = vpop.f32.mrf.mxu0 }
 0x2de   :  { %v698_v59 = vmax.f32 %v656_v54, 0.0  ;;  %v648_v60 = vadd.f32 %v2678_v27, %v647_v21  ;;  %v3505_v54 = vld [vmem:[#allocation10 + $0x60] sm:$0xff]  }
 0x2df   :  { %v3084_v22 = vpop.f32.mrf.mxu0 }
 0x2e0   :  { %v669_v45 = vadd.f32 %v3084_v22, %v2678_v27  ;;  %v3893_v1 = vpack.c.bf16 %v698_v59, %v697_v62  ;;  %v696_v2 = vmax.f32 %v648_v60, 0.0  ;;  %v3920_v59 = vld [vmem:[%s4115_s3 + $0x1] ss:$0 sm:$0xff] }
 0x2e1   :  { %v660_v23 = vpop.f32.mrf.mxu0 }
 0x2e2   :  { %v701_v52 = vmax.f32 %v669_v45, 0.0  ;;  %v661_v53 = vadd.f32 %v2678_v27, %v660_v23  ;;  %v3897_v7 = vpack.c.bf16 %v696_v2, %v695_v4  ;;  %v3491_v45 = vld [vmem:[#allocation8 + $0x50] sm:$0xff]  }
 0x2e3   :  { %v3085_v24 = vpop.f32.mrf.mxu0 }
 0x2e4   :  { %v672_v41 = vadd.f32 %v3085_v24, %v2678_v27  ;;  %v699_v58 = vmax.f32 %v661_v53, 0.0  ;;  %v3504_v53 = vld [vmem:[#allocation10 + $0x68] sm:$0xff]  }
 0x2e5   :  { %v663_v25 = vpop.f32.mrf.mxu0 }
 0x2e6   :  { %v702_v49 = vmax.f32 %v672_v41, 0.0  ;;  %v664_v50 = vadd.f32 %v2678_v27, %v663_v25 }
 0x2e7   :  { %v3088_v26 = vpop.f32.mrf.mxu0 }
 0x2e8   :  { %v685_v29 = vadd.f32 %v3088_v26, %v2678_v27  ;;  %v3885_v55 = vpack.c.bf16 %v702_v49, %v701_v52  ;;  %v700_v56 = vmax.f32 %v664_v50, 0.0  ;;  %v3494_v49 = vld [vmem:[#allocation10 + $0x38] sm:$0xff]   ;;  %v3503_v52 = vld [vmem:[#allocation10 + $0x70] sm:$0xff]  }
 0x2e9   :  { %v676_v28 = vpop.f32.mrf.mxu0  ;;  %v3502_v50 = vld [vmem:[#allocation10 + $0x78] sm:$0xff]  }
 0x2ea   :  { %v677_v38 = vadd.f32 %v2678_v27, %v676_v28  ;;  %v705_v42 = vmax.f32 %v685_v29, 0.0  ;;  %v3889_v61 = vpack.c.bf16 %v700_v56, %v699_v58  ;;  %3186 = vmatprep.subr.bf16.mxu0 %v3502_v50  ;;  %v3506_v56 = vld [vmem:[#allocation10 + $0x58] sm:$0xff]  }
 0x2eb   :  { %v3089_v30 = vpop.f32.mrf.mxu0 }
 0x2ec   :  { %v688_v39 = vadd.f32 %v3089_v30, %v2678_v27  ;;  %v703_v46 = vmax.f32 %v677_v38, 0.0 }
 0x2ed   :  { %v679_v40 = vpop.f32.mrf.mxu0 }
 0x2ee   :  { %v706_v43 = vmax.f32 %v688_v39, 0.0  ;;  %v680_v44 = vadd.f32 %v2678_v27, %v679_v40 }
 0x2f0   :  { %v3878_v47 = vpack.c.bf16 %v706_v43, %v705_v42  ;;  %v704_v48 = vmax.f32 %v680_v44, 0.0 }
 0x2f2   :  { %v3880_v51 = vpack.c.bf16 %v704_v48, %v703_v46  ;;  %3090 = vmatprep.subr.bf16.mxu1 %v3878_v47  ;;  %v3492_v46 = vld [vmem:[#allocation8 + $0x48] sm:$0xff]   ;;  %v3493_v48 = vld [vmem:[#allocation8 + $0x40] sm:$0xff]  }
 0x2f3   :  { %3091 = vmatpush3.bf16.msra.mxu1 %v3878_v47 }
 0x2f4   :  { %3092 = vmatprep.subr.bf16.mxu1 %v3880_v51 }
 0x2f7   :  { %3093 = vmatpush3.bf16.msra.mxu1 %v3880_v51 }
 0x2f8   :  { %3094 = vmatprep.subr.bf16.mxu1 %v3885_v55 }
 0x2fb   :  { %3095 = vmatpush3.bf16.msra.mxu1 %v3885_v55 }
 0x2fc   :  { %3096 = vmatprep.subr.bf16.mxu1 %v3889_v61 }
 0x2ff   :  { %3097 = vmatpush3.bf16.msra.mxu1 %v3889_v61 }
 0x300   :  { %3098 = vmatprep.subr.bf16.mxu1 %v3893_v1 }
 0x303   :  { %3099 = vmatpush3.bf16.msra.mxu1 %v3893_v1 }
 0x304   :  { %3100 = vmatprep.subr.bf16.mxu1 %v3897_v7 }
 0x307   :  { %3101 = vmatpush3.bf16.msra.mxu1 %v3897_v7 }
 0x308   :  { %3102 = vmatprep.subr.bf16.mxu1 %v3901_v12 }
 0x30b   :  { %3103 = vmatpush3.bf16.msra.mxu1 %v3901_v12 }
 0x30c   :  { %3104 = vmatprep.subr.bf16.mxu1 %v3905_v14 }
 0x30f   :  { %3105 = vmatpush3.bf16.msra.mxu1 %v3905_v14 }
 0x310   :  { %3154 = vmatprep.subr.bf16.mxu1 %v3486_v16 }
 0x312   :  { %3107 = vmatmul.mubr.bf16.vlgmr.msra.gmra.mxu1 %v3850_v31  ;;  %v3487_v31 = vld [vmem:[#allocation8 + $0x70] sm:$0xff]  }
 0x313   :  { %3110 = vmatprep.mubr.bf16.mxu1 %v3852_v32  ;;  %3155 = vmatpush3.bf16.msra.mxu1 %v3486_v16  ;;  %v3488_v32 = vld [vmem:[#allocation8 + $0x68] sm:$0xff]   ;;  %v3495_v16 = vld [vmem:[#allocation10 + $0x30] sm:$0xff]  }
 0x314   :  { %3156 = vmatprep.subr.bf16.mxu1 %v3487_v31 }
 0x317   :  { %3157 = vmatpush3.bf16.msra.mxu1 %v3487_v31 }
 0x318   :  { %3158 = vmatprep.subr.bf16.mxu1 %v3488_v32 }
 0x31a   :  { %3111 = vmatmul.mubr.bf16.gmra.mxu1 %v3856_v33  ;;  %v3489_v33 = vld [vmem:[#allocation8 + $0x60] sm:$0xff]  }
 0x31b   :  { %3114 = vmatprep.mubr.bf16.mxu1 %v3858_v34  ;;  %3159 = vmatpush3.bf16.msra.mxu1 %v3488_v32  ;;  %v3490_v34 = vld [vmem:[#allocation8 + $0x58] sm:$0xff]  }
 0x31c   :  { %3160 = vmatprep.subr.bf16.mxu1 %v3489_v33 }
 0x31f   :  { %3161 = vmatpush3.bf16.msra.mxu1 %v3489_v33 }
 0x320   :  { %3162 = vmatprep.subr.bf16.mxu1 %v3490_v34 }
 0x322   :  { %3115 = vmatmul.mubr.bf16.gmra.mxu1 %v3862_v35 }
 0x323   :  { %3118 = vmatprep.mubr.bf16.mxu1 %v3864_v36  ;;  %3163 = vmatpush3.bf16.msra.mxu1 %v3490_v34 }
 0x324   :  { %3164 = vmatprep.subr.bf16.mxu1 %v3491_v45 }
 0x327   :  { %3165 = vmatpush3.bf16.msra.mxu1 %v3491_v45 }
 0x328   :  { %3166 = vmatprep.subr.bf16.mxu1 %v3492_v46 }
 0x32a   :  { %3119 = vmatmul.mubr.bf16.gmra.mxu1 %v3868_v37 }
 0x32b   :  { %3167 = vmatpush3.bf16.msra.mxu1 %v3492_v46 }
 0x32c   :  { %3168 = vmatprep.subr.bf16.mxu1 %v3493_v48 }
 0x32f   :  { %3169 = vmatpush3.bf16.msra.mxu1 %v3493_v48 }
 0x330   :  { %3218 = vmatprep.subr.bf16.mxu1 %v3494_v49 }
 0x3d2   :  { %v3108_v35 = vpop.f32.mrf.mxu1 }
 0x3d4   :  { %v765_v36 = vpop.f32.mrf.mxu1 }
 0x3d6   :  { %v3109_v37 = vpop.f32.mrf.mxu1 }
 0x3d7   :  { %v829_v19 = vpack.c.bf16 %v3109_v37, %v3108_v35 }
 0x3d8   :  { %v768_v17 = vpop.f32.mrf.mxu1 }
 0x3d9   :  { %v828_v18 = vpack.c.bf16 %v768_v17, %v765_v36  ;;  %v3496_v17 = vld [vmem:[#allocation10 + $0x28] sm:$0xff]  }
 0x3da   :  { %v3112_v20 = vpop.f32.mrf.mxu1 }
 0x3db   :  { %3138 = vmatprep.mubr.bf16.mxu0 %v828_v18 }
 0x3dc   :  { %v781_v21 = vpop.f32.mrf.mxu1  ;;  %3139 = vmatmul.mubr.bf16.vlgmr.msra.gmra.mxu0 %v829_v19 }
 0x3dd   :  { %3187 = vmatpush3.bf16.msra.mxu0 %v3502_v50 }
 0x3de   :  { %v3113_v22 = vpop.f32.mrf.mxu1  ;;  %3188 = vmatprep.subr.bf16.mxu0 %v3503_v52 }
 0x3df   :  { %v831_v25 = vpack.c.bf16 %v3113_v22, %v3112_v20 }
 0x3e0   :  { %v784_v23 = vpop.f32.mrf.mxu1 }
 0x3e1   :  { %v830_v24 = vpack.c.bf16 %v784_v23, %v781_v21  ;;  %3189 = vmatpush3.bf16.msra.mxu0 %v3503_v52 }
 0x3e2   :  { %v3116_v26 = vpop.f32.mrf.mxu1  ;;  %3190 = vmatprep.subr.bf16.mxu0 %v3504_v53 }
 0x3e3   :  { %3142 = vmatprep.mubr.bf16.mxu0 %v830_v24 }
 0x3e4   :  { %v797_v27 = vpop.f32.mrf.mxu1  ;;  %3143 = vmatmul.mubr.bf16.gmra.mxu0 %v831_v25  ;;  %v3497_v25 = vld [vmem:[#allocation10 + $0x20] sm:$0xff]  }
 0x3e5   :  { %3191 = vmatpush3.bf16.msra.mxu0 %v3504_v53 }
 0x3e6   :  { %v3117_v28 = vpop.f32.mrf.mxu1  ;;  %3192 = vmatprep.subr.bf16.mxu0 %v3505_v54 }
 0x3e7   :  { %v833_v38 = vpack.c.bf16 %v3117_v28, %v3116_v26 }
 0x3e8   :  { %v800_v29 = vpop.f32.mrf.mxu1 }
 0x3e9   :  { %v832_v30 = vpack.c.bf16 %v800_v29, %v797_v27  ;;  %3193 = vmatpush3.bf16.msra.mxu0 %v3505_v54 }
 0x3ea   :  { %v3120_v39 = vpop.f32.mrf.mxu1  ;;  %3194 = vmatprep.subr.bf16.mxu0 %v3506_v56 }
 0x3eb   :  { %3146 = vmatprep.mubr.bf16.mxu0 %v832_v30 }
 0x3ec   :  { %v813_v40 = vpop.f32.mrf.mxu1  ;;  %3147 = vmatmul.mubr.bf16.gmra.mxu0 %v833_v38 }
 0x3ed   :  { %3195 = vmatpush3.bf16.msra.mxu0 %v3506_v56 }
 0x3ee   :  { %v3121_v41 = vpop.f32.mrf.mxu1 }
 0x3ef   :  { %v835_v44 = vpack.c.bf16 %v3121_v41, %v3120_v39 }
 0x3f0   :  { %v816_v42 = vpop.f32.mrf.mxu1 }
 0x3f1   :  { %v834_v43 = vpack.c.bf16 %v816_v42, %v813_v40  ;;  %v3498_v40 = vld [vmem:[#allocation10 + $0x18] sm:$0xff]  }
 0x3f3   :  { %3150 = vmatprep.mubr.bf16.mxu0 %v834_v43 }
 0x3f4   :  { %3151 = vmatmul.mubr.bf16.gmra.mxu0 %v835_v44 }
 0x49c   :  { %v3140_v57 = vpop.f32.mrf.mxu0 }
 0x49d   :  { %v952_v0 = vadd.f32 %v3140_v57, %v3920_v59 }
 0x49e   :  { %v943_v58 = vpop.f32.mrf.mxu0 }
 0x49f   :  { %v944_v62 = vadd.f32 %v3920_v59, %v943_v58  ;;  %v1008_v9 = vmax.f32 %v952_v0, 0.0  ;;  %v3500_v58 = vld [vmem:[#allocation10 + $0x8] sm:$0xff]  }
 0x4a0   :  { %v3141_v60 = vpop.f32.mrf.mxu0 }
 0x4a1   :  { %v955_v63 = vadd.f32 %v3141_v60, %v3920_v59  ;;  %v1006_v6 = vmax.f32 %v944_v62, 0.0 }
 0x4a2   :  { %v946_v2 = vpop.f32.mrf.mxu0 }
 0x4a3   :  { %v947_v3 = vadd.f32 %v3920_v59, %v946_v2  ;;  %v1009_v4 = vmax.f32 %v955_v63, 0.0 }
 0x4a4   :  { %v3144_v5 = vpop.f32.mrf.mxu0 }
 0x4a5   :  { %v1007_v8 = vmax.f32 %v947_v3, 0.0  ;;  %v1023_v15 = vpack.c.bf16 %v1009_v4, %v1008_v9  ;;  %v968_v33 = vadd.f32 %v3144_v5, %v3920_v59  ;;  %v3501_v3 = vld [vmem:[#allocation10] sm:$0xff]  }
 0x4a6   :  { %v959_v13 = vpop.f32.mrf.mxu0  ;;  %v3509_v4 = vld [vmem:[#allocation10 + $0x40] sm:$0xff]  }
 0x4a7   :  { %v1022_v10 = vpack.c.bf16 %v1007_v8, %v1006_v6  ;;  %v960_v31 = vadd.f32 %v3920_v59, %v959_v13  ;;  %v1012_v20 = vmax.f32 %v968_v33, 0.0 }
 0x4a8   :  { %v3145_v11 = vpop.f32.mrf.mxu0 }
 0x4a9   :  { %v971_v32 = vadd.f32 %v3145_v11, %v3920_v59  ;;  %3170 = vmatprep.mubr.bf16.mxu1 %v1022_v10  ;;  %v1010_v18 = vmax.f32 %v960_v31, 0.0 }
 0x4aa   :  { %v962_v34 = vpop.f32.mrf.mxu0  ;;  %3171 = vmatmul.mubr.bf16.vlgmr.msra.gmra.mxu1 %v1023_v15 }
 0x4ab   :  { %v963_v35 = vadd.f32 %v3920_v59, %v962_v34  ;;  %3219 = vmatpush3.bf16.msra.mxu1 %v3494_v49  ;;  %v1013_v36 = vmax.f32 %v971_v32, 0.0  ;;  %v3499_v49 = vld [vmem:[#allocation10 + $0x10] sm:$0xff]  }
 0x4ac   :  { %v3148_v37 = vpop.f32.mrf.mxu0  ;;  %3220 = vmatprep.subr.bf16.mxu1 %v3495_v16 }
 0x4ad   :  { %v1011_v19 = vmax.f32 %v963_v35, 0.0  ;;  %v1025_v23 = vpack.c.bf16 %v1013_v36, %v1012_v20  ;;  %v984_v28 = vadd.f32 %v3148_v37, %v3920_v59 }
 0x4ae   :  { %v975_v21 = vpop.f32.mrf.mxu0 }
 0x4af   :  { %v1024_v22 = vpack.c.bf16 %v1011_v19, %v1010_v18  ;;  %3221 = vmatpush3.bf16.msra.mxu1 %v3495_v16  ;;  %v976_v26 = vadd.f32 %v3920_v59, %v975_v21  ;;  %v1016_v43 = vmax.f32 %v984_v28, 0.0 }
 0x4b0   :  { %v3149_v24 = vpop.f32.mrf.mxu0  ;;  %3222 = vmatprep.subr.bf16.mxu1 %v3496_v17 }
 0x4b1   :  { %v987_v27 = vadd.f32 %v3149_v24, %v3920_v59  ;;  %3174 = vmatprep.mubr.bf16.mxu1 %v1024_v22  ;;  %v1014_v41 = vmax.f32 %v976_v26, 0.0 }
 0x4b2   :  { %v978_v29 = vpop.f32.mrf.mxu0  ;;  %3175 = vmatmul.mubr.bf16.gmra.mxu1 %v1025_v23 }
 0x4b3   :  { %v979_v30 = vadd.f32 %v3920_v59, %v978_v29  ;;  %3223 = vmatpush3.bf16.msra.mxu1 %v3496_v17  ;;  %v1017_v38 = vmax.f32 %v987_v27, 0.0 }
 0x4b4   :  { %v3152_v39 = vpop.f32.mrf.mxu0  ;;  %3224 = vmatprep.subr.bf16.mxu1 %v3497_v25 }
 0x4b5   :  { %v1015_v42 = vmax.f32 %v979_v30, 0.0  ;;  %v1027_v46 = vpack.c.bf16 %v1017_v38, %v1016_v43  ;;  %v1000_v53 = vadd.f32 %v3152_v39, %v3920_v59 }
 0x4b6   :  { %v991_v44 = vpop.f32.mrf.mxu0 }
 0x4b7   :  { %v1026_v45 = vpack.c.bf16 %v1015_v42, %v1014_v41  ;;  %3225 = vmatpush3.bf16.msra.mxu1 %v3497_v25  ;;  %v992_v50 = vadd.f32 %v3920_v59, %v991_v44  ;;  %v1020_v63 = vmax.f32 %v1000_v53, 0.0 }
 0x4b8   :  { %v3153_v48 = vpop.f32.mrf.mxu0  ;;  %3226 = vmatprep.subr.bf16.mxu1 %v3498_v40 }
 0x4b9   :  { %v1003_v52 = vadd.f32 %v3153_v48, %v3920_v59  ;;  %3178 = vmatprep.mubr.bf16.mxu1 %v1026_v45  ;;  %v1018_v60 = vmax.f32 %v992_v50, 0.0 }
 0x4ba   :  { %v994_v54 = vpop.f32.mrf.mxu0  ;;  %3179 = vmatmul.mubr.bf16.gmra.mxu1 %v1027_v46 }
 0x4bb   :  { %v995_v56 = vadd.f32 %v3920_v59, %v994_v54  ;;  %3227 = vmatpush3.bf16.msra.mxu1 %v3498_v40  ;;  %v1021_v57 = vmax.f32 %v1003_v52, 0.0  ;;  %v3507_v59 = vld [vmem:[#allocation10 + $0x50] sm:$0xff]  }
 0x4bc   :  { %3228 = vmatprep.subr.bf16.mxu1 %v3499_v49  ;;  %3196 = vmatprep.subr.bf16.mxu0 %v3507_v59 }
 0x4bd   :  { %v1019_v62 = vmax.f32 %v995_v56, 0.0  ;;  %v1029_v2 = vpack.c.bf16 %v1021_v57, %v1020_v63  ;;  %3197 = vmatpush3.bf16.msra.mxu0 %v3507_v59  ;;  %v3550_v63 = vld [vmem:[#allocation2] sm:$0xff]  }
 0x4be   :  { %v3554_v59 = vld [vmem:[#allocation2 + $0x20] sm:$0xff]  }
 0x4bf   :  { %v1028_v0 = vpack.c.bf16 %v1019_v62, %v1018_v60  ;;  %3229 = vmatpush3.bf16.msra.mxu1 %v3499_v49 }
 0x4c0   :  { %3230 = vmatprep.subr.bf16.mxu1 %v3500_v58 }
 0x4c1   :  { %3182 = vmatprep.mubr.bf16.mxu1 %v1028_v0  ;;  %v3551_v0 = vld [vmem:[#allocation2 + $0x8] sm:$0xff]  }
 0x4c2   :  { %3183 = vmatmul.mubr.bf16.gmra.mxu1 %v1029_v2  ;;  %v3552_v2 = vld [vmem:[#allocation2 + $0x10] sm:$0xff]  }
 0x4c3   :  { %3231 = vmatpush3.bf16.msra.mxu1 %v3500_v58  ;;  %3234 = vmatprep.mubr.bf16.mxu1 %v3905_v14  ;;  %v3508_v14 = vld [vmem:[#allocation10 + $0x48] sm:$0xff]  }
 0x4c4   :  { %3232 = vmatprep.subr.bf16.mxu1 %v3501_v3  ;;  %3198 = vmatprep.subr.bf16.mxu0 %v3508_v14 }
 0x4c5   :  { %3199 = vmatpush3.bf16.msra.mxu0 %v3508_v14  ;;  %v3555_v14 = vld [vmem:[#allocation2 + $0x28] sm:$0xff]  }
 0x4c6   :  { %3200 = vmatprep.subr.bf16.mxu0 %v3509_v4 }
 0x4c7   :  { %3233 = vmatpush3.bf16.msra.mxu1 %v3501_v3  ;;  %v3553_v3 = vld [vmem:[#allocation2 + $0x18] sm:$0xff]  }
 0x4c9   :  { %3201 = vmatpush3.bf16.msra.mxu0 %v3509_v4  ;;  %v3556_v4 = vld [vmem:[#allocation2 + $0x30] sm:$0xff]  }
 0x4ca   :  { %3235 = vmatmul.mubr.bf16.vlgmr.msra.gmra.mxu1 %v3901_v12 }
 0x4cb   :  { %3238 = vmatprep.mubr.bf16.mxu1 %v3897_v7 }
 0x4d2   :  { %3239 = vmatmul.mubr.bf16.gmra.mxu1 %v3893_v1 }
 0x4d3   :  { %3242 = vmatprep.mubr.bf16.mxu1 %v3889_v61  ;;  %v2698_v61 = vld [vmem:[%s4117_s5 + $0x1] ss:$0 sm:$0xff] }
 0x4da   :  { %3243 = vmatmul.mubr.bf16.gmra.mxu1 %v3885_v55 }
 0x4db   :  { %3246 = vmatprep.mubr.bf16.mxu1 %v3880_v51 }
 0x4e2   :  { %3247 = vmatmul.mubr.bf16.gmra.mxu1 %v3878_v47 }
 0x56a   :  { %v3172_v7 = vpop.f32.mrf.mxu1 }
 0x56b   :  { %v1146_v5 = vadd.f32 %v3172_v7, %v2698_v61  ;;  %v3557_v7 = vld [vmem:[#allocation2 + $0x38] sm:$0xff]  }
 0x56c   :  { %v1137_v12 = vpop.f32.mrf.mxu1 }
 0x56d   :  { %v1138_v1 = vadd.f32 %v2698_v61, %v1137_v12  ;;  %v1202_v15 = vmax.f32 %v1146_v5, 0.0  ;;  %v3510_v12 = vld [vmem:[#allocation7 + $0xb8] sm:$0xff]   ;;  %v3515_v5 = vld [vmem:[#allocation7 + $0x90] sm:$0xff]  }
 0x56e   :  { %v3173_v55 = vpop.f32.mrf.mxu1  ;;  %3282 = vmatprep.subr.bf16.mxu1 %v3510_v12 }
 0x56f   :  { %v1149_v51 = vadd.f32 %v3173_v55, %v2698_v61  ;;  %v1200_v13 = vmax.f32 %v1138_v1, 0.0  ;;  %3283 = vmatpush3.bf16.msra.mxu1 %v3510_v12  ;;  %v3512_v55 = vld [vmem:[#allocation7 + $0xa8] sm:$0xff]   ;;  %v3513_v1 = vld [vmem:[#allocation7 + $0xa0] sm:$0xff]  }
 0x570   :  { %v1140_v47 = vpop.f32.mrf.mxu1 }
 0x571   :  { %v1141_v6 = vadd.f32 %v2698_v61, %v1140_v47  ;;  %v1203_v8 = vmax.f32 %v1149_v51, 0.0  ;;  %v3514_v51 = vld [vmem:[#allocation7 + $0x98] sm:$0xff]   ;;  %v3516_v47 = vld [vmem:[#allocation7 + $0x88] sm:$0xff]  }
 0x572   :  { %v3176_v9 = vpop.f32.mrf.mxu1 }
 0x573   :  { %v1201_v10 = vmax.f32 %v1141_v6, 0.0  ;;  %v3951_v31 = vpack.c.bf16 %v1203_v8, %v1202_v15  ;;  %v1162_v35 = vadd.f32 %v3176_v9, %v2698_v61  ;;  %v3517_v6 = vld [vmem:[#allocation7 + $0x80] sm:$0xff]   ;;  %v3518_v8 = vld [vmem:[#allocation8 + $0xb8] sm:$0xff]   ;;  %v3519_v9 = vld [vmem:[#allocation8 + $0xb0] sm:$0xff]  }
 0x574   :  { %v1153_v11 = vpop.f32.mrf.mxu1  ;;  %v3522_v15 = vld [vmem:[#allocation8 + $0x98] sm:$0xff]  }
 0x575   :  { %v3949_v16 = vpack.c.bf16 %v1201_v10, %v1200_v13  ;;  %v1154_v33 = vadd.f32 %v2698_v61, %v1153_v11  ;;  %v1206_v21 = vmax.f32 %v1162_v35, 0.0  ;;  %v3520_v13 = vld [vmem:[#allocation8 + $0xa8] sm:$0xff]   ;;  %v3521_v10 = vld [vmem:[#allocation8 + $0xa0] sm:$0xff]  }
 0x576   :  { %v3177_v32 = vpop.f32.mrf.mxu1 }
 0x577   :  { %v1165_v34 = vadd.f32 %v3177_v32, %v2698_v61  ;;  %3202 = vmatprep.mubr.bf16.mxu0 %v3949_v16  ;;  %v1204_v19 = vmax.f32 %v1154_v33, 0.0 }
 0x578   :  { %v1156_v36 = vpop.f32.mrf.mxu1  ;;  %3203 = vmatmul.mubr.bf16.vlgmr.msra.gmra.mxu0 %v3951_v31 }
 0x579   :  { %v1157_v37 = vadd.f32 %v2698_v61, %v1156_v36  ;;  %v1207_v17 = vmax.f32 %v1165_v34, 0.0 }
 0x57a   :  { %v3180_v18 = vpop.f32.mrf.mxu1 }
 0x57b   :  { %v1205_v20 = vmax.f32 %v1157_v37, 0.0  ;;  %v1219_v24 = vpack.c.bf16 %v1207_v17, %v1206_v21  ;;  %v1178_v28 = vadd.f32 %v3180_v18, %v2698_v61 }
 0x57c   :  { %v1169_v22 = vpop.f32.mrf.mxu1 }
 0x57d   :  { %v1218_v23 = vpack.c.bf16 %v1205_v20, %v1204_v19  ;;  %v1170_v26 = vadd.f32 %v2698_v61, %v1169_v22  ;;  %v1210_v42 = vmax.f32 %v1178_v28, 0.0 }
 0x57e   :  { %v3181_v25 = vpop.f32.mrf.mxu1 }
 0x57f   :  { %v1181_v27 = vadd.f32 %v3181_v25, %v2698_v61  ;;  %3206 = vmatprep.mubr.bf16.mxu0 %v1218_v23  ;;  %v1208_v40 = vmax.f32 %v1170_v26, 0.0 }
 0x580   :  { %v1172_v29 = vpop.f32.mrf.mxu1  ;;  %3207 = vmatmul.mubr.bf16.gmra.mxu0 %v1219_v24 }
 0x581   :  { %v1173_v30 = vadd.f32 %v2698_v61, %v1172_v29  ;;  %v1211_v38 = vmax.f32 %v1181_v27, 0.0 }
 0x582   :  { %v3184_v39 = vpop.f32.mrf.mxu1 }
 0x583   :  { %v1209_v41 = vmax.f32 %v1173_v30, 0.0  ;;  %v1194_v45 = vadd.f32 %v3184_v39, %v2698_v61  ;;  %v1221_v46 = vpack.c.bf16 %v1211_v38, %v1210_v42 }
 0x584   :  { %v1185_v43 = vpop.f32.mrf.mxu1 }
 0x585   :  { %v1220_v44 = vpack.c.bf16 %v1209_v41, %v1208_v40  ;;  %v1186_v49 = vadd.f32 %v2698_v61, %v1185_v43  ;;  %v1214_v53 = vmax.f32 %v1194_v45, 0.0 }
 0x586   :  { %v3185_v48 = vpop.f32.mrf.mxu1 }
 0x587   :  { %v1197_v50 = vadd.f32 %v3185_v48, %v2698_v61  ;;  %3210 = vmatprep.mubr.bf16.mxu0 %v1220_v44  ;;  %v1212_v57 = vmax.f32 %v1186_v49, 0.0 }
 0x588   :  { %v1188_v52 = vpop.f32.mrf.mxu1  ;;  %3211 = vmatmul.mubr.bf16.gmra.mxu0 %v1221_v46 }
 0x589   :  { %v1215_v54 = vmax.f32 %v1197_v50, 0.0  ;;  %v1189_v56 = vadd.f32 %v2698_v61, %v1188_v52  ;;  %v3511_v61 = vld [vmem:[#allocation7 + $0xb0] sm:$0xff]  }
 0x58a   :  { %3284 = vmatprep.subr.bf16.mxu1 %v3511_v61 }
 0x58b   :  { %v1223_v58 = vpack.c.bf16 %v1215_v54, %v1214_v53  ;;  %v1213_v60 = vmax.f32 %v1189_v56, 0.0  ;;  %3285 = vmatpush3.bf16.msra.mxu1 %v3511_v61 }
 0x58c   :  { %3286 = vmatprep.subr.bf16.mxu1 %v3512_v55 }
 0x58d   :  { %v1222_v62 = vpack.c.bf16 %v1213_v60, %v1212_v57  ;;  %3250 = vmatprep.subr.bf16.mxu0 %v1223_v58  ;;  %v3524_v60 = vld [vmem:[#allocation8 + $0x88] sm:$0xff]  }
 0x58e   :  { %3251 = vmatpush3.bf16.msra.mxu0 %v1223_v58 }
 0x58f   :  { %3214 = vmatprep.mubr.bf16.mxu0 %v1222_v62  ;;  %3252 = vmatprep.subr.bf16.mxu0 %v1222_v62 }
 0x590   :  { %3215 = vmatmul.mubr.bf16.gmra.mxu0 %v1223_v58  ;;  %3287 = vmatpush3.bf16.msra.mxu1 %v3512_v55  ;;  %v3523_v58 = vld [vmem:[#allocation8 + $0x90] sm:$0xff]  }
 0x591   :  { %3266 = vmatprep.mubr.bf16.mxu0 %v3550_v63  ;;  %3288 = vmatprep.subr.bf16.mxu1 %v3513_v1  ;;  %v3526_v63 = vld [vmem:[#allocation10 + $0xb8] sm:$0xff]  }
 0x592   :  { %3253 = vmatpush3.bf16.msra.mxu0 %v1222_v62  ;;  %v3525_v62 = vld [vmem:[#allocation8 + $0x80] sm:$0xff]  }
 0x593   :  { %3254 = vmatprep.subr.bf16.mxu0 %v1221_v46 }
 0x594   :  { %3289 = vmatpush3.bf16.msra.mxu1 %v3513_v1 }
 0x595   :  { %3290 = vmatprep.subr.bf16.mxu1 %v3514_v51 }
 0x596   :  { %3255 = vmatpush3.bf16.msra.mxu0 %v1221_v46 }
 0x597   :  { %3256 = vmatprep.subr.bf16.mxu0 %v1220_v44 }
 0x598   :  { %3291 = vmatpush3.bf16.msra.mxu1 %v3514_v51 }
 0x599   :  { %3292 = vmatprep.subr.bf16.mxu1 %v3515_v5 }
 0x59a   :  { %3257 = vmatpush3.bf16.msra.mxu0 %v1220_v44 }
 0x59b   :  { %3258 = vmatprep.subr.bf16.mxu0 %v1219_v24 }
 0x59c   :  { %3293 = vmatpush3.bf16.msra.mxu1 %v3515_v5 }
 0x59d   :  { %3294 = vmatprep.subr.bf16.mxu1 %v3516_v47 }
 0x59e   :  { %3259 = vmatpush3.bf16.msra.mxu0 %v1219_v24 }
 0x59f   :  { %3260 = vmatprep.subr.bf16.mxu0 %v1218_v23 }
 0x5a0   :  { %3295 = vmatpush3.bf16.msra.mxu1 %v3516_v47 }
 0x5a1   :  { %3296 = vmatprep.subr.bf16.mxu1 %v3517_v6 }
 0x5a2   :  { %3261 = vmatpush3.bf16.msra.mxu0 %v1218_v23 }
 0x5a3   :  { %3262 = vmatprep.subr.bf16.mxu0 %v3951_v31 }
 0x5a4   :  { %3297 = vmatpush3.bf16.msra.mxu1 %v3517_v6 }
 0x5a5   :  { %3346 = vmatprep.subr.bf16.mxu1 %v3526_v63 }
 0x5a6   :  { %3263 = vmatpush3.bf16.msra.mxu0 %v3951_v31 }
 0x5a7   :  { %3264 = vmatprep.subr.bf16.mxu0 %v3949_v16 }
 0x5aa   :  { %3265 = vmatpush3.bf16.msra.mxu0 %v3949_v16 }
 0x5ab   :  { %3314 = vmatprep.subr.bf16.mxu0 %v3518_v8 }
 0x5ad   :  { %3267 = vmatmul.mubr.bf16.vlgmr.msra.gmra.mxu0 %v3551_v0  ;;  %v3527_v0 = vld [vmem:[#allocation10 + $0xb0] sm:$0xff]  }
 0x5ae   :  { %3270 = vmatprep.mubr.bf16.mxu0 %v3552_v2  ;;  %3315 = vmatpush3.bf16.msra.mxu0 %v3518_v8  ;;  %v3528_v2 = vld [vmem:[#allocation10 + $0xa8] sm:$0xff]  }
 0x5af   :  { %3316 = vmatprep.subr.bf16.mxu0 %v3519_v9 }
 0x5b2   :  { %3317 = vmatpush3.bf16.msra.mxu0 %v3519_v9 }
 0x5b3   :  { %3318 = vmatprep.subr.bf16.mxu0 %v3520_v13 }
 0x5b5   :  { %3271 = vmatmul.mubr.bf16.gmra.mxu0 %v3553_v3  ;;  %v3529_v3 = vld [vmem:[#allocation10 + $0xa0] sm:$0xff]  }
 0x5b6   :  { %3274 = vmatprep.mubr.bf16.mxu0 %v3554_v59  ;;  %3319 = vmatpush3.bf16.msra.mxu0 %v3520_v13  ;;  %v3530_v59 = vld [vmem:[#allocation10 + $0x98] sm:$0xff]  }
 0x5b7   :  { %3320 = vmatprep.subr.bf16.mxu0 %v3521_v10 }
 0x5ba   :  { %3321 = vmatpush3.bf16.msra.mxu0 %v3521_v10 }
 0x5bb   :  { %3322 = vmatprep.subr.bf16.mxu0 %v3522_v15 }
 0x5bd   :  { %3275 = vmatmul.mubr.bf16.gmra.mxu0 %v3555_v14  ;;  %v3991_v14 = vpop.f32.mrf.mxu1 }
 0x5be   :  { %3278 = vmatprep.mubr.bf16.mxu0 %v3556_v4  ;;  %3323 = vmatpush3.bf16.msra.mxu0 %v3522_v15 }
 0x5bf   :  { %3324 = vmatprep.subr.bf16.mxu0 %v3523_v58  ;;  %v3993_v4 = vpop.f32.mrf.mxu1 }
 0x5c2   :  { %3325 = vmatpush3.bf16.msra.mxu0 %v3523_v58 }
 0x5c3   :  { %3326 = vmatprep.subr.bf16.mxu0 %v3524_v60 }
 0x5c5   :  { %3279 = vmatmul.mubr.bf16.gmra.mxu0 %v3557_v7  ;;  %v3995_v7 = vpop.f32.mrf.mxu1 }
 0x5c6   :  { %3327 = vmatpush3.bf16.msra.mxu0 %v3524_v60 }
 0x5c7   :  { %3328 = vmatprep.subr.bf16.mxu0 %v3525_v62  ;;  %v3997_v12 = vpop.f32.mrf.mxu1 }
 0x5c9   :  { %v3999_v61 = vpop.f32.mrf.mxu1 }
 0x5ca   :  { %3329 = vmatpush3.bf16.msra.mxu0 %v3525_v62 }
 0x5cb   :  { %v4001_v55 = vpop.f32.mrf.mxu1 }
 0x5cd   :  { %v4003_v1 = vpop.f32.mrf.mxu1 }
 0x5cf   :  { %v4005_v51 = vpop.f32.mrf.mxu1 }
 0x5d1   :  { %v4007_v5 = vpop.f32.mrf.mxu1 }
 0x5d3   :  { %v4009_v47 = vpop.f32.mrf.mxu1 }
 0x5d5   :  { %v4011_v6 = vpop.f32.mrf.mxu1 }
 0x5d7   :  { %v4013_v8 = vpop.f32.mrf.mxu1 }
 0x5d9   :  { %v4015_v9 = vpop.f32.mrf.mxu1 }
 0x5db   :  { %v4017_v13 = vpop.f32.mrf.mxu1 }
 0x5dd   :  { %v4019_v10 = vpop.f32.mrf.mxu1 }
 0x5df   :  { %v4021_v15 = vpop.f32.mrf.mxu1 }
 0x638   :  { %v3959_v11 = vpop.f32.mrf.mxu0 }
 0x63a   :  { %v3961_v16 = vpop.f32.mrf.mxu0 }
 0x63c   :  { %v3963_v31 = vpop.f32.mrf.mxu0 }
 0x63e   :  { %v3965_v32 = vpop.f32.mrf.mxu0 }
 0x640   :  { %v3967_v33 = vpop.f32.mrf.mxu0 }
 0x642   :  { %v3969_v34 = vpop.f32.mrf.mxu0 }
 0x644   :  { %v3971_v35 = vpop.f32.mrf.mxu0 }
 0x646   :  { %v3973_v36 = vpop.f32.mrf.mxu0 }
 0x648   :  { %v3975_v37 = vpop.f32.mrf.mxu0 }
 0x64a   :  { %v3977_v17 = vpop.f32.mrf.mxu0 }
 0x64c   :  { %v3979_v18 = vpop.f32.mrf.mxu0 }
 0x64e   :  { %v3981_v19 = vpop.f32.mrf.mxu0 }
 0x650   :  { %v3983_v20 = vpop.f32.mrf.mxu0 }
 0x652   :  { %v3985_v21 = vpop.f32.mrf.mxu0 }
 0x654   :  { %v3987_v22 = vpop.f32.mrf.mxu0 }
 0x656   :  { %v3989_v23 = vpop.f32.mrf.mxu0 }
 0x66d   :  { %v3268_v24 = vpop.f32.mrf.mxu0 }
 0x66f   :  { %v1565_v25 = vpop.f32.mrf.mxu0 }
 0x671   :  { %v3269_v26 = vpop.f32.mrf.mxu0 }
 0x672   :  { %v1629_v29 = vpack.c.bf16 %v3269_v26, %v3268_v24  ;;  %v2724_v26 = vld [vmem:[%s4115_s3 + $0x2] ss:$0 sm:$0xff] }
 0x673   :  { %v1568_v27 = vpop.f32.mrf.mxu0 }
 0x674   :  { %v1628_v28 = vpack.c.bf16 %v1568_v27, %v1565_v25 }
 0x675   :  { %v3272_v30 = vpop.f32.mrf.mxu0 }
 0x676   :  { %3298 = vmatprep.mubr.bf16.mxu1 %v1628_v28 }
 0x677   :  { %v1581_v38 = vpop.f32.mrf.mxu0  ;;  %3299 = vmatmul.mubr.bf16.vlgmr.msra.gmra.mxu1 %v1629_v29 }
 0x678   :  { %3347 = vmatpush3.bf16.msra.mxu1 %v3526_v63 }
 0x679   :  { %v3273_v39 = vpop.f32.mrf.mxu0  ;;  %3348 = vmatprep.subr.bf16.mxu1 %v3527_v0 }
 0x67a   :  { %v1631_v42 = vpack.c.bf16 %v3273_v39, %v3272_v30 }
 0x67b   :  { %v1584_v40 = vpop.f32.mrf.mxu0 }
 0x67c   :  { %v1630_v41 = vpack.c.bf16 %v1584_v40, %v1581_v38  ;;  %3349 = vmatpush3.bf16.msra.mxu1 %v3527_v0 }
 0x67d   :  { %v3276_v43 = vpop.f32.mrf.mxu0  ;;  %3350 = vmatprep.subr.bf16.mxu1 %v3528_v2 }
 0x67e   :  { %3302 = vmatprep.mubr.bf16.mxu1 %v1630_v41 }
 0x67f   :  { %v1597_v44 = vpop.f32.mrf.mxu0  ;;  %3303 = vmatmul.mubr.bf16.gmra.mxu1 %v1631_v42 }
 0x680   :  { %3351 = vmatpush3.bf16.msra.mxu1 %v3528_v2 }
 0x681   :  { %v3277_v45 = vpop.f32.mrf.mxu0  ;;  %3352 = vmatprep.subr.bf16.mxu1 %v3529_v3 }
 0x682   :  { %v1633_v49 = vpack.c.bf16 %v3277_v45, %v3276_v43 }
 0x683   :  { %v1600_v46 = vpop.f32.mrf.mxu0 }
 0x684   :  { %v1632_v48 = vpack.c.bf16 %v1600_v46, %v1597_v44  ;;  %3353 = vmatpush3.bf16.msra.mxu1 %v3529_v3 }
 0x685   :  { %v3280_v50 = vpop.f32.mrf.mxu0  ;;  %3354 = vmatprep.subr.bf16.mxu1 %v3530_v59 }
 0x686   :  { %3306 = vmatprep.mubr.bf16.mxu1 %v1632_v48 }
 0x687   :  { %v1613_v52 = vpop.f32.mrf.mxu0  ;;  %3307 = vmatmul.mubr.bf16.gmra.mxu1 %v1633_v49 }
 0x688   :  { %3355 = vmatpush3.bf16.msra.mxu1 %v3530_v59 }
 0x689   :  { %v3281_v53 = vpop.f32.mrf.mxu0 }
 0x68a   :  { %v1635_v57 = vpack.c.bf16 %v3281_v53, %v3280_v50 }
 0x68b   :  { %v1616_v54 = vpop.f32.mrf.mxu0 }
 0x68c   :  { %v1634_v56 = vpack.c.bf16 %v1616_v54, %v1613_v52 }
 0x68e   :  { %3310 = vmatprep.mubr.bf16.mxu1 %v1634_v56 }
 0x68f   :  { %3311 = vmatmul.mubr.bf16.gmra.mxu1 %v1635_v57 }
 0x737   :  { %v3300_v24 = vpop.f32.mrf.mxu1 }
 0x738   :  { %v1752_v30 = vadd.f32 %v3300_v24, %v2724_v26 }
 0x739   :  { %v1743_v25 = vpop.f32.mrf.mxu1 }
 0x73a   :  { %v1744_v28 = vadd.f32 %v2724_v26, %v1743_v25  ;;  %v1808_v44 = vmax.f32 %v1752_v30, 0.0 }
 0x73b   :  { %v3301_v27 = vpop.f32.mrf.mxu1 }
 0x73c   :  { %v1755_v29 = vadd.f32 %v3301_v27, %v2724_v26  ;;  %v1806_v42 = vmax.f32 %v1744_v28, 0.0 }
 0x73d   :  { %v1746_v38 = vpop.f32.mrf.mxu1 }
 0x73e   :  { %v1747_v39 = vadd.f32 %v2724_v26, %v1746_v38  ;;  %v1809_v40 = vmax.f32 %v1755_v29, 0.0 }
 0x73f   :  { %v3304_v41 = vpop.f32.mrf.mxu1 }
 0x740   :  { %v1807_v43 = vmax.f32 %v1747_v39, 0.0  ;;  %v1823_v48 = vpack.c.bf16 %v1809_v40, %v1808_v44  ;;  %v1768_v53 = vadd.f32 %v3304_v41, %v2724_v26 }
 0x741   :  { %v1759_v45 = vpop.f32.mrf.mxu1 }
 0x742   :  { %v1822_v46 = vpack.c.bf16 %v1807_v43, %v1806_v42  ;;  %v1760_v50 = vadd.f32 %v2724_v26, %v1759_v45  ;;  %v1812_v63 = vmax.f32 %v1768_v53, 0.0 }
 0x743   :  { %v3305_v49 = vpop.f32.mrf.mxu1 }
 0x744   :  { %v1771_v52 = vadd.f32 %v3305_v49, %v2724_v26  ;;  %3330 = vmatprep.mubr.bf16.mxu0 %v1822_v46  ;;  %v1810_v60 = vmax.f32 %v1760_v50, 0.0 }
 0x745   :  { %v1762_v54 = vpop.f32.mrf.mxu1  ;;  %3331 = vmatmul.mubr.bf16.vlgmr.msra.gmra.mxu0 %v1823_v48 }
 0x746   :  { %v1763_v56 = vadd.f32 %v2724_v26, %v1762_v54  ;;  %v1813_v57 = vmax.f32 %v1771_v52, 0.0 }
 0x747   :  { %v3308_v58 = vpop.f32.mrf.mxu1 }
 0x748   :  { %v1811_v62 = vmax.f32 %v1763_v56, 0.0  ;;  %v1825_v3 = vpack.c.bf16 %v1813_v57, %v1812_v63  ;;  %v1784_v27 = vadd.f32 %v3308_v58, %v2724_v26  ;;  %v3532_v63 = vld [vmem:[#allocation10 + $0x88] sm:$0xff]  }
 0x749   :  { %v1775_v0 = vpop.f32.mrf.mxu1 }
 0x74a   :  { %v1824_v2 = vpack.c.bf16 %v1811_v62, %v1810_v60  ;;  %v1776_v24 = vadd.f32 %v2724_v26, %v1775_v0  ;;  %v1816_v41 = vmax.f32 %v1784_v27, 0.0  ;;  %v3531_v62 = vld [vmem:[#allocation10 + $0x90] sm:$0xff]   ;;  %v3533_v0 = vld [vmem:[#allocation10 + $0x80] sm:$0xff]  }
 0x74b   :  { %v3309_v59 = vpop.f32.mrf.mxu1  ;;  %3356 = vmatprep.subr.bf16.mxu1 %v3531_v62  ;;  %v2734_v27 = vld [vmem:[%s4117_s5 + $0x2] ss:$0 sm:$0xff] }
 0x74c   :  { %v1787_v25 = vadd.f32 %v3309_v59, %v2724_v26  ;;  %3334 = vmatprep.mubr.bf16.mxu0 %v1824_v2  ;;  %v1814_v39 = vmax.f32 %v1776_v24, 0.0  ;;  %3357 = vmatpush3.bf16.msra.mxu1 %v3531_v62  ;;  %v3534_v2 = vld [vmem:[#allocation11 + $0x38] sm:$0xff]   ;;  %v3537_v59 = vld [vmem:[#allocation11 + $0x20] sm:$0xff]  }
 0x74d   :  { %v1778_v28 = vpop.f32.mrf.mxu1  ;;  %3335 = vmatmul.mubr.bf16.gmra.mxu0 %v1825_v3  ;;  %3358 = vmatprep.subr.bf16.mxu1 %v3532_v63  ;;  %v3535_v3 = vld [vmem:[#allocation11 + $0x30] sm:$0xff]  }
 0x74e   :  { %v1779_v29 = vadd.f32 %v2724_v26, %v1778_v28  ;;  %v1817_v30 = vmax.f32 %v1787_v25, 0.0  ;;  %3378 = vmatprep.subr.bf16.mxu0 %v3534_v2 }
 0x74f   :  { %v3312_v38 = vpop.f32.mrf.mxu1  ;;  %3379 = vmatpush3.bf16.msra.mxu0 %v3534_v2 }
 0x750   :  { %v1815_v40 = vmax.f32 %v1779_v29, 0.0  ;;  %v1827_v44 = vpack.c.bf16 %v1817_v30, %v1816_v41  ;;  %v1800_v49 = vadd.f32 %v3312_v38, %v2724_v26  ;;  %3359 = vmatpush3.bf16.msra.mxu1 %v3532_v63  ;;  %3380 = vmatprep.subr.bf16.mxu0 %v3535_v3 }
 0x751   :  { %v1791_v42 = vpop.f32.mrf.mxu1  ;;  %3360 = vmatprep.subr.bf16.mxu1 %v3533_v0 }
 0x752   :  { %v1826_v43 = vpack.c.bf16 %v1815_v40, %v1814_v39  ;;  %v1792_v46 = vadd.f32 %v2724_v26, %v1791_v42  ;;  %v1820_v57 = vmax.f32 %v1800_v49, 0.0 }
 0x753   :  { %v3313_v45 = vpop.f32.mrf.mxu1  ;;  %3381 = vmatpush3.bf16.msra.mxu0 %v3535_v3 }
 0x754   :  { %v1803_v48 = vadd.f32 %v3313_v45, %v2724_v26  ;;  %3338 = vmatprep.mubr.bf16.mxu0 %v1826_v43  ;;  %v1818_v54 = vmax.f32 %v1792_v46, 0.0  ;;  %3361 = vmatpush3.bf16.msra.mxu1 %v3533_v0 }
 0x755   :  { %v1794_v50 = vpop.f32.mrf.mxu1  ;;  %3339 = vmatmul.mubr.bf16.gmra.mxu0 %v1827_v44 }
 0x756   :  { %v1795_v52 = vadd.f32 %v2724_v26, %v1794_v50  ;;  %v1821_v53 = vmax.f32 %v1803_v48, 0.0  ;;  %v3536_v26 = vld [vmem:[#allocation11 + $0x28] sm:$0xff]  }
 0x757   :  { %3382 = vmatprep.subr.bf16.mxu0 %v3536_v26 }
 0x758   :  { %v1819_v56 = vmax.f32 %v1795_v52, 0.0  ;;  %v1829_v60 = vpack.c.bf16 %v1821_v53, %v1820_v57  ;;  %3383 = vmatpush3.bf16.msra.mxu0 %v3536_v26 }
 0x759   :  { %3384 = vmatprep.subr.bf16.mxu0 %v3537_v59 }
 0x75a   :  { %v1828_v58 = vpack.c.bf16 %v1819_v56, %v1818_v54 }
 0x75c   :  { %3342 = vmatprep.mubr.bf16.mxu0 %v1828_v58  ;;  %3385 = vmatpush3.bf16.msra.mxu0 %v3537_v59 }
 0x75d   :  { %3343 = vmatmul.mubr.bf16.gmra.mxu0 %v1829_v60 }
 0x805   :  { %v3332_v24 = vpop.f32.mrf.mxu0 }
 0x806   :  { %v1946_v38 = vadd.f32 %v3332_v24, %v2734_v27 }
 0x807   :  { %v1937_v25 = vpop.f32.mrf.mxu0 }
 0x808   :  { %v1938_v29 = vadd.f32 %v2734_v27, %v1937_v25  ;;  %v2002_v45 = vmax.f32 %v1946_v38, 0.0 }
 0x809   :  { %v3333_v28 = vpop.f32.mrf.mxu0 }
 0x80a   :  { %v1949_v30 = vadd.f32 %v3333_v28, %v2734_v27  ;;  %v2000_v43 = vmax.f32 %v1938_v29, 0.0 }
 0x80b   :  { %v1940_v39 = vpop.f32.mrf.mxu0 }
 0x80c   :  { %v1941_v40 = vadd.f32 %v2734_v27, %v1940_v39  ;;  %v2003_v41 = vmax.f32 %v1949_v30, 0.0 }
 0x80d   :  { %v3336_v42 = vpop.f32.mrf.mxu0 }
 0x80e   :  { %v2001_v44 = vmax.f32 %v1941_v40, 0.0  ;;  %v2017_v49 = vpack.c.bf16 %v2003_v41, %v2002_v45  ;;  %v1962_v54 = vadd.f32 %v3336_v42, %v2734_v27 }
 0x80f   :  { %v1953_v46 = vpop.f32.mrf.mxu0 }
 0x810   :  { %v2016_v48 = vpack.c.bf16 %v2001_v44, %v2000_v43  ;;  %v1954_v52 = vadd.f32 %v2734_v27, %v1953_v46  ;;  %v2006_v0 = vmax.f32 %v1962_v54, 0.0 }
 0x811   :  { %v3337_v50 = vpop.f32.mrf.mxu0 }
 0x812   :  { %v1965_v53 = vadd.f32 %v3337_v50, %v2734_v27  ;;  %3362 = vmatprep.mubr.bf16.mxu1 %v2016_v48  ;;  %v2004_v62 = vmax.f32 %v1954_v52, 0.0 }
 0x813   :  { %v1956_v56 = vpop.f32.mrf.mxu0  ;;  %3363 = vmatmul.mubr.bf16.vlgmr.msra.gmra.mxu1 %v2017_v49 }
 0x814   :  { %v1957_v57 = vadd.f32 %v2734_v27, %v1956_v56  ;;  %v2007_v58 = vmax.f32 %v1965_v53, 0.0 }
 0x815   :  { %v3340_v60 = vpop.f32.mrf.mxu0 }
 0x816   :  { %v2005_v63 = vmax.f32 %v1957_v57, 0.0  ;;  %v2019_v26 = vpack.c.bf16 %v2007_v58, %v2006_v0  ;;  %v1978_v28 = vadd.f32 %v3340_v60, %v2734_v27  ;;  %v3539_v0 = vld [vmem:[#allocation11 + $0x10] sm:$0xff]  }
 0x817   :  { %v1969_v2 = vpop.f32.mrf.mxu0 }
 0x818   :  { %v2018_v3 = vpack.c.bf16 %v2005_v63, %v2004_v62  ;;  %v1970_v24 = vadd.f32 %v2734_v27, %v1969_v2  ;;  %v2010_v42 = vmax.f32 %v1978_v28, 0.0  ;;  %v3538_v63 = vld [vmem:[#allocation11 + $0x18] sm:$0xff]   ;;  %v3540_v2 = vld [vmem:[#allocation11 + $0x8] sm:$0xff]   ;;  %v1477_v28 = vadd.f32 %v3991_v14, %v3959_v11 }
 0x819   :  { %v3341_v59 = vpop.f32.mrf.mxu0  ;;  %3386 = vmatprep.subr.bf16.mxu0 %v3538_v63 }
 0x81a   :  { %v1981_v25 = vadd.f32 %v3341_v59, %v2734_v27  ;;  %3366 = vmatprep.mubr.bf16.mxu1 %v2018_v3  ;;  %v2008_v40 = vmax.f32 %v1970_v24, 0.0  ;;  %3387 = vmatpush3.bf16.msra.mxu0 %v3538_v63  ;;  %v3541_v3 = vld [vmem:[#allocation11] sm:$0xff]   ;;  %v3544_v59 = vld [vmem:[#allocation13 + $0x28] sm:$0xff]   ;;  %v1509_v63 = vadd.f32 %v4007_v5, %v3975_v37 }
 0x81b   :  { %v1972_v29 = vpop.f32.mrf.mxu0  ;;  %3367 = vmatmul.mubr.bf16.gmra.mxu1 %v2019_v26  ;;  %3388 = vmatprep.subr.bf16.mxu0 %v3539_v0  ;;  %v3543_v26 = vld [vmem:[#allocation13 + $0x30] sm:$0xff]   ;;  %v3545_v24 = vld [vmem:[#allocation13 + $0x20] sm:$0xff]  }
 0x81c   :  { %v1973_v30 = vadd.f32 %v2734_v27, %v1972_v29  ;;  %v2011_v38 = vmax.f32 %v1981_v25, 0.0  ;;  %v3546_v25 = vld [vmem:[#allocation13 + $0x18] sm:$0xff]  }
 0x81d   :  { %v3344_v39 = vpop.f32.mrf.mxu0 }
 0x81e   :  { %v2009_v41 = vmax.f32 %v1973_v30, 0.0  ;;  %v2021_v45 = vpack.c.bf16 %v2011_v38, %v2010_v42  ;;  %v1994_v50 = vadd.f32 %v3344_v39, %v2734_v27  ;;  %3389 = vmatpush3.bf16.msra.mxu0 %v3539_v0  ;;  %v1469_v30 = vadd.f32 %v3993_v4, %v3961_v16  ;;  %v4036_v39 = vld [vmem:[%s4119_s7] ss:$0 sm:$0xff] }
 0x81f   :  { %v1985_v43 = vpop.f32.mrf.mxu0  ;;  %3390 = vmatprep.subr.bf16.mxu0 %v3540_v2  ;;  %v1493_v16 = vadd.f32 %v3999_v61, %v3967_v33 }
 0x820   :  { %v2020_v44 = vpack.c.bf16 %v2009_v41, %v2008_v40  ;;  %v1986_v48 = vadd.f32 %v2734_v27, %v1985_v43  ;;  %v2014_v58 = vmax.f32 %v1994_v50, 0.0  ;;  %v1480_v41 = vadd.f32 %v3995_v7, %v3963_v31 }
 0x821   :  { %v3345_v46 = vpop.f32.mrf.mxu0  ;;  %v1485_v31 = vadd.f32 %v4001_v55, %v3969_v34 }
 0x822   :  { %v1997_v49 = vadd.f32 %v3345_v46, %v2734_v27  ;;  %3370 = vmatprep.mubr.bf16.mxu1 %v2020_v44  ;;  %v2012_v56 = vmax.f32 %v1986_v48, 0.0  ;;  %3391 = vmatpush3.bf16.msra.mxu0 %v3540_v2  ;;  %v1472_v44 = vadd.f32 %v3997_v12, %v3965_v32  ;;  %v1501_v2 = vadd.f32 %v4009_v47, %v3977_v17 }
 0x823   :  { %v1988_v52 = vpop.f32.mrf.mxu0  ;;  %3371 = vmatmul.mubr.bf16.gmra.mxu1 %v2021_v45  ;;  %3392 = vmatprep.subr.bf16.mxu0 %v3541_v3 }
 0x824   :  { %v1989_v53 = vadd.f32 %v2734_v27, %v1988_v52  ;;  %v2015_v54 = vmax.f32 %v1997_v49, 0.0  ;;  %v3542_v27 = vld [vmem:[#allocation13 + $0x38] sm:$0xff]   ;;  %v1496_v52 = vadd.f32 %v4003_v1, %v3971_v35 }
 0x825   :  { %3410 = vmatprep.subr.bf16.mxu1 %v3542_v27 }
 0x826   :  { %v2013_v57 = vmax.f32 %v1989_v53, 0.0  ;;  %v2023_v62 = vpack.c.bf16 %v2015_v54, %v2014_v58  ;;  %3393 = vmatpush3.bf16.msra.mxu0 %v3541_v3  ;;  %3411 = vmatpush3.bf16.msra.mxu1 %v3542_v27  ;;  %v1488_v58 = vadd.f32 %v4005_v51, %v3973_v36 }
 0x827   :  { %3412 = vmatprep.subr.bf16.mxu1 %v3543_v26 }
 0x828   :  { %v2022_v60 = vpack.c.bf16 %v2013_v57, %v2012_v56 }
 0x82a   :  { %3374 = vmatprep.mubr.bf16.mxu1 %v2022_v60  ;;  %3413 = vmatpush3.bf16.msra.mxu1 %v3543_v26 }
 0x82b   :  { %3375 = vmatmul.mubr.bf16.gmra.mxu1 %v2023_v62  ;;  %3414 = vmatprep.subr.bf16.mxu1 %v3544_v59 }
 0x82e   :  { %3415 = vmatpush3.bf16.msra.mxu1 %v3544_v59  ;;  %v1512_v59 = vadd.f32 %v4011_v6, %v3979_v18 }
 0x82f   :  { %3416 = vmatprep.subr.bf16.mxu1 %v3545_v24 }
 0x832   :  { %3417 = vmatpush3.bf16.msra.mxu1 %v3545_v24 }
 0x833   :  { %3418 = vmatprep.subr.bf16.mxu1 %v3546_v25 }
 0x836   :  { %3419 = vmatpush3.bf16.msra.mxu1 %v3546_v25 }
 0x8d3   :  { %v3364_v29 = vpop.f32.mrf.mxu1 }
 0x8d4   :  { %v2188_v38 = vadd.f32 %v3364_v29, %v1477_v28 }
 0x8d5   :  { %v2123_v40 = vpop.f32.mrf.mxu1 }
 0x8d6   :  { %v2186_v42 = vadd.f32 %v2123_v40, %v1469_v30  ;;  %v2211_v11 = vadd.f32 %v4036_v39, %v2188_v38  ;;  %v1504_v30 = vadd.f32 %v4013_v8, %v3981_v19 }
 0x8d7   :  { %v3365_v43 = vpop.f32.mrf.mxu1 }
 0x8d8   :  { %v2189_v14 = vadd.f32 %v3365_v43, %v1480_v41  ;;  %v2209_v4 = vadd.f32 %v4036_v39, %v2186_v42  ;;  %v2227_v49 = vmax.f32 %v2211_v11, 0.0  ;;  %v1525_v41 = vadd.f32 %v4015_v9, %v3983_v20 }
 0x8d9   :  { %v2126_v45 = vpop.f32.mrf.mxu1  ;;  %v1517_v43 = vadd.f32 %v4017_v13, %v3985_v21 }
 0x8da   :  { %v2212_v46 = vadd.f32 %v4036_v39, %v2189_v14  ;;  %v2187_v48 = vadd.f32 %v2126_v45, %v1472_v44  ;;  %v2225_v54 = vmax.f32 %v2209_v4, 0.0  ;;  %v1528_v45 = vadd.f32 %v4019_v10, %v3987_v22 }
 0x8db   :  { %v3368_v7 = vpop.f32.mrf.mxu1 }
 0x8dc   :  { %v2228_v50 = vmax.f32 %v2212_v46, 0.0  ;;  %v2210_v32 = vadd.f32 %v4036_v39, %v2187_v48  ;;  %v2192_v12 = vadd.f32 %v3368_v7, %v1493_v16 }
 0x8dd   :  { %v2139_v53 = vpop.f32.mrf.mxu1 }
 0x8de   :  { %v2242_v33 = vpack.c.bf16 %v2228_v50, %v2227_v49  ;;  %v2226_v61 = vmax.f32 %v2210_v32, 0.0  ;;  %v2190_v56 = vadd.f32 %v2139_v53, %v1485_v31  ;;  %v2215_v34 = vadd.f32 %v4036_v39, %v2192_v12 }
 0x8df   :  { %v3369_v57 = vpop.f32.mrf.mxu1  ;;  %v1520_v31 = vadd.f32 %v4021_v15, %v3989_v23  ;;  %v3547_v15 = vld [vmem:[#allocation13 + $0x10] sm:$0xff]  }
 0x8e0   :  { %v2193_v55 = vadd.f32 %v3369_v57, %v1496_v52  ;;  %v2241_v60 = vpack.c.bf16 %v2226_v61, %v2225_v54  ;;  %v2213_v0 = vadd.f32 %v4036_v39, %v2190_v56  ;;  %v2231_v36 = vmax.f32 %v2215_v34, 0.0  ;;  %3420 = vmatprep.subr.bf16.mxu1 %v3547_v15  ;;  %v3548_v61 = vld [vmem:[#allocation13 + $0x8] sm:$0xff]   ;;  %v3549_v56 = vld [vmem:[#allocation13] sm:$0xff]  }
 0x8e1   :  { %v2142_v62 = vpop.f32.mrf.mxu1  ;;  %3421 = vmatpush3.bf16.msra.mxu1 %v3547_v15 }
 0x8e2   :  { %v2216_v35 = vadd.f32 %v4036_v39, %v2193_v55  ;;  %v2191_v1 = vadd.f32 %v2142_v62, %v1488_v58  ;;  %3394 = vmatprep.mubr.bf16.mxu0 %v2241_v60  ;;  %v2229_v5 = vmax.f32 %v2213_v0, 0.0  ;;  %3422 = vmatprep.subr.bf16.mxu1 %v3548_v61 }
 0x8e3   :  { %v3372_v3 = vpop.f32.mrf.mxu1  ;;  %3395 = vmatmul.mubr.bf16.vlgmr.msra.gmra.mxu0 %v2242_v33 }
 0x8e4   :  { %v2232_v51 = vmax.f32 %v2216_v35, 0.0  ;;  %v2214_v27 = vadd.f32 %v4036_v39, %v2191_v1  ;;  %v2196_v26 = vadd.f32 %v3372_v3, %v1509_v63 }
 0x8e5   :  { %v2155_v37 = vpop.f32.mrf.mxu1  ;;  %3423 = vmatpush3.bf16.msra.mxu1 %v3548_v61 }
 0x8e6   :  { %v2230_v24 = vmax.f32 %v2214_v27, 0.0  ;;  %v2194_v25 = vadd.f32 %v2155_v37, %v1501_v2  ;;  %v2244_v28 = vpack.c.bf16 %v2232_v51, %v2231_v36  ;;  %v2219_v17 = vadd.f32 %v4036_v39, %v2196_v26  ;;  %3424 = vmatprep.subr.bf16.mxu1 %v3549_v56 }
 0x8e7   :  { %v3373_v29 = vpop.f32.mrf.mxu1 }
 0x8e8   :  { %v2197_v47 = vadd.f32 %v3373_v29, %v1512_v59  ;;  %v2243_v38 = vpack.c.bf16 %v2230_v24, %v2229_v5  ;;  %v2217_v42 = vadd.f32 %v4036_v39, %v2194_v25  ;;  %v2235_v19 = vmax.f32 %v2219_v17, 0.0 }
 0x8e9   :  { %v2158_v40 = vpop.f32.mrf.mxu1  ;;  %3425 = vmatpush3.bf16.msra.mxu1 %v3549_v56 }
 0x8ea   :  { %v2220_v18 = vadd.f32 %v4036_v39, %v2197_v47  ;;  %v2195_v6 = vadd.f32 %v2158_v40, %v1504_v30  ;;  %3398 = vmatprep.mubr.bf16.mxu0 %v2243_v38  ;;  %v2233_v9 = vmax.f32 %v2217_v42, 0.0 }
 0x8eb   :  { %v3376_v44 = vpop.f32.mrf.mxu1  ;;  %3399 = vmatmul.mubr.bf16.gmra.mxu0 %v2244_v28 }
 0x8ec   :  { %v2236_v8 = vmax.f32 %v2220_v18, 0.0  ;;  %v2218_v11 = vadd.f32 %v4036_v39, %v2195_v6  ;;  %v2200_v14 = vadd.f32 %v3376_v44, %v1525_v41 }
 0x8ed   :  { %v2171_v20 = vpop.f32.mrf.mxu1 }
 0x8ee   :  { %v2234_v16 = vmax.f32 %v2218_v11, 0.0  ;;  %v2198_v4 = vadd.f32 %v2171_v20, %v1517_v43  ;;  %v2246_v46 = vpack.c.bf16 %v2236_v8, %v2235_v19  ;;  %v2223_v21 = vadd.f32 %v4036_v39, %v2200_v14 }
 0x8ef   :  { %v3377_v48 = vpop.f32.mrf.mxu1 }
 0x8f0   :  { %v2201_v13 = vadd.f32 %v3377_v48, %v1528_v45  ;;  %v2245_v7 = vpack.c.bf16 %v2234_v16, %v2233_v9  ;;  %v2221_v50 = vadd.f32 %v4036_v39, %v2198_v4  ;;  %v2239_v22 = vmax.f32 %v2223_v21, 0.0 }
 0x8f1   :  { %v2174_v49 = vpop.f32.mrf.mxu1 }
 0x8f2   :  { %v2224_v32 = vadd.f32 %v4036_v39, %v2201_v13  ;;  %v2199_v12 = vadd.f32 %v2174_v49, %v1520_v31  ;;  %3402 = vmatprep.mubr.bf16.mxu0 %v2245_v7  ;;  %v2237_v53 = vmax.f32 %v2221_v50, 0.0 }
 0x8f3   :  { %3403 = vmatmul.mubr.bf16.gmra.mxu0 %v2246_v46 }
 0x8f4   :  { %v2240_v10 = vmax.f32 %v2224_v32, 0.0  ;;  %v2222_v52 = vadd.f32 %v4036_v39, %v2199_v12  ;;  %v2752_v39 = vld [vmem:[%s4121_s9] ss:$0 sm:$0xff] }
 0x8f6   :  { %v2238_v54 = vmax.f32 %v2222_v52, 0.0  ;;  %v2248_v33 = vpack.c.bf16 %v2240_v10, %v2239_v22 }
 0x8f8   :  { %v2247_v23 = vpack.c.bf16 %v2238_v54, %v2237_v53  ;;  %v4088_v53 = vld [vmem:[%s4123_s11] ss:$0 sm:$0xff]  ;;  %s3739_s11 = smov [#allocation14]  }
 0x8f9   :  { %s2646_s14 = sshll.u32 %s3739_s11, 4  ;;  %s2647_s14 = int_to_ptr.vmem [resolvable:$true] %s2646_s14 }
 0x8fa   :  { %3406 = vmatprep.mubr.bf16.mxu0 %v2247_v23  ;;  %s3698_s17 = scalar_lea.vmem %s2647_s14, 2048  ;;  %p3703_p8 = scmp.lt.s32.totalorder %s2647_s14, %s2647_s14 }
 0x8fb   :  { %3407 = vmatmul.mubr.bf16.gmra.mxu0 %v2248_v33  ;;  %p3699_p7 = scmp.ne.s32.totalorder %s2647_s14, %s3698_s17  ;;  %p3704_p9 = scmp.lt.s32.totalorder %s3698_s17, %s3698_s17 }
 0x8fd   :  { %p3705_p10 = por %p3704_p9, %p3703_p8 }
 0x8ff   :  { %p3706_p11 = pnand %p3705_p10, %p3699_p7 }
 0x9a3   :  { %v3396_v57 = vpop.f32.mrf.mxu0 }
 0x9a4   :  { %v2363_v62 = vadd.f32 %v3396_v57, %v2752_v39 }
 0x9a5   :  { %v2354_v58 = vpop.f32.mrf.mxu0 }
 0x9a6   :  { %v2355_v55 = vadd.f32 %v2752_v39, %v2354_v58  ;;  %v2419_v36 = vmax.f32 %v2363_v62, 0.0 }
 0x9a7   :  { %v3397_v34 = vpop.f32.mrf.mxu0 }
 0x9a8   :  { %v2366_v60 = vadd.f32 %v3397_v34, %v2752_v39  ;;  %v2417_v2 = vmax.f32 %v2355_v55, 0.0 }
 0x9a9   :  { %v2357_v63 = vpop.f32.mrf.mxu0 }
 0x9aa   :  { %v2358_v0 = vadd.f32 %v2752_v39, %v2357_v63  ;;  %v2420_v35 = vmax.f32 %v2366_v60, 0.0 }
 0x9ab   :  { %v3400_v1 = vpop.f32.mrf.mxu0 }
 0x9ac   :  { %v2418_v3 = vmax.f32 %v2358_v0, 0.0  ;;  %v2434_v26 = vpack.c.bf16 %v2420_v35, %v2419_v36  ;;  %v2379_v24 = vadd.f32 %v3400_v1, %v2752_v39 }
 0x9ad   :  { %v2370_v51 = vpop.f32.mrf.mxu0 }
 0x9ae   :  { %v2433_v27 = vpack.c.bf16 %v2418_v3, %v2417_v2  ;;  %v2371_v37 = vadd.f32 %v2752_v39, %v2370_v51  ;;  %v2423_v38 = vmax.f32 %v2379_v24, 0.0 }
 0x9af   :  { %v3401_v59 = vpop.f32.mrf.mxu0 }
 0x9b0   :  { %v2382_v5 = vadd.f32 %v3401_v59, %v2752_v39  ;;  %3426 = vmatprep.mubr.bf16.mxu1 %v2433_v27  ;;  %v2421_v17 = vmax.f32 %v2371_v37, 0.0 }
 0x9b1   :  { %v2373_v25 = vpop.f32.mrf.mxu0  ;;  %3427 = vmatmul.mubr.bf16.vlgmr.msra.gmra.mxu1 %v2434_v26 }
 0x9b2   :  { %v2374_v28 = vadd.f32 %v2752_v39, %v2373_v25  ;;  %v2424_v29 = vmax.f32 %v2382_v5, 0.0 }
 0x9b3   :  { %v3404_v30 = vpop.f32.mrf.mxu0 }
 0x9b4   :  { %v2422_v47 = vmax.f32 %v2374_v28, 0.0  ;;  %v2436_v42 = vpack.c.bf16 %v2424_v29, %v2423_v38  ;;  %v2395_v44 = vadd.f32 %v3404_v30, %v2752_v39 }
 0x9b5   :  { %v2386_v40 = vpop.f32.mrf.mxu0 }
 0x9b6   :  { %v2435_v41 = vpack.c.bf16 %v2422_v47, %v2421_v17  ;;  %v2387_v6 = vadd.f32 %v2752_v39, %v2386_v40  ;;  %v2427_v9 = vmax.f32 %v2395_v44, 0.0 }
 0x9b7   :  { %v3405_v18 = vpop.f32.mrf.mxu0 }
 0x9b8   :  { %v2398_v43 = vadd.f32 %v3405_v18, %v2752_v39  ;;  %3430 = vmatprep.mubr.bf16.mxu1 %v2435_v41  ;;  %v2425_v45 = vmax.f32 %v2387_v6, 0.0 }
 0x9b9   :  { %v2389_v19 = vpop.f32.mrf.mxu0  ;;  %3431 = vmatmul.mubr.bf16.gmra.mxu1 %v2436_v42 }
 0x9ba   :  { %v2390_v8 = vadd.f32 %v2752_v39, %v2389_v19  ;;  %v2428_v11 = vmax.f32 %v2398_v43, 0.0 }
 0x9bb   :  { %v3408_v14 = vpop.f32.mrf.mxu0 }
 0x9bc   :  { %v2426_v20 = vmax.f32 %v2390_v8, 0.0  ;;  %v2438_v46 = vpack.c.bf16 %v2428_v11, %v2427_v9  ;;  %v2411_v13 = vadd.f32 %v3408_v14, %v2752_v39 }
 0x9bd   :  { %v2402_v16 = vpop.f32.mrf.mxu0 }
 0x9be   :  { %v2437_v4 = vpack.c.bf16 %v2426_v20, %v2425_v45  ;;  %v2403_v31 = vadd.f32 %v2752_v39, %v2402_v16  ;;  %v2431_v22 = vmax.f32 %v2411_v13, 0.0 }
 0x9bf   :  { %v3409_v48 = vpop.f32.mrf.mxu0 }
 0x9c0   :  { %v2414_v21 = vadd.f32 %v3409_v48, %v2752_v39  ;;  %3434 = vmatprep.mubr.bf16.mxu1 %v2437_v4  ;;  %v2429_v32 = vmax.f32 %v2403_v31, 0.0 }
 0x9c1   :  { %v2405_v7 = vpop.f32.mrf.mxu0  ;;  %3435 = vmatmul.mubr.bf16.gmra.mxu1 %v2438_v46 }
 0x9c2   :  { %v2406_v49 = vadd.f32 %v2752_v39, %v2405_v7  ;;  %v2432_v50 = vmax.f32 %v2414_v21, 0.0 }
 0x9c4   :  { %v2430_v12 = vmax.f32 %v2406_v49, 0.0  ;;  %v2440_v52 = vpack.c.bf16 %v2432_v50, %v2431_v22 }
 0x9c6   :  { %v2439_v10 = vpack.c.bf16 %v2430_v12, %v2429_v32 }
 0x9c8   :  { %3438 = vmatprep.mubr.bf16.mxu1 %v2439_v10 }
 0x9c9   :  { %3439 = vmatmul.mubr.bf16.gmra.mxu1 %v2440_v52 }
 0xa71   :  { %v3428_v54 = vpop.f32.mrf.mxu1 }
 0xa72   :  { %v2555_v33 = vadd.f32 %v3428_v54, %v4088_v53 }
 0xa73   :  { %v2546_v23 = vpop.f32.mrf.mxu1 }
 0xa74   :  { %v2611_v15 = vmax.f32 %v2555_v33, 0.0  ;;  %v2547_v61 = vadd.f32 %v4088_v53, %v2546_v23 }
 0xa75   :  { %v3429_v56 = vpop.f32.mrf.mxu1 }
 0xa76   :  { %2627 = vst [vmem:[#allocation14 + $0x10] sm:$0xff] %v2611_v15  ;;  %v2609_v57 = vmax.f32 %v2547_v61, 0.0  ;;  %v2558_v58 = vadd.f32 %v3429_v56, %v4088_v53 }
 0xa77   :  { %v2549_v39 = vpop.f32.mrf.mxu1 }
 0xa78   :  { %2625 = vst [vmem:[#allocation14] sm:$0xff] %v2609_v57  ;;  %v2612_v34 = vmax.f32 %v2558_v58, 0.0  ;;  %v2550_v55 = vadd.f32 %v4088_v53, %v2549_v39 }
 0xa79   :  { %v3432_v60 = vpop.f32.mrf.mxu1 }
 0xa7a   :  { %2628 = vst [vmem:[#allocation14 + $0x18] sm:$0xff] %v2612_v34  ;;  %v2610_v62 = vmax.f32 %v2550_v55, 0.0  ;;  %v2571_v63 = vadd.f32 %v3432_v60, %v4088_v53 }
 0xa7b   :  { %v2562_v0 = vpop.f32.mrf.mxu1 }
 0xa7c   :  { %2626 = vst [vmem:[#allocation14 + $0x8] sm:$0xff] %v2610_v62  ;;  %v2615_v35 = vmax.f32 %v2571_v63, 0.0  ;;  %v2563_v1 = vadd.f32 %v4088_v53, %v2562_v0 }
 0xa7d   :  { %v3433_v2 = vpop.f32.mrf.mxu1 }
 0xa7e   :  { %2631 = vst [vmem:[#allocation14 + $0x30] sm:$0xff] %v2615_v35  ;;  %v2613_v3 = vmax.f32 %v2563_v1, 0.0  ;;  %v2574_v36 = vadd.f32 %v3433_v2, %v4088_v53 }
 0xa7f   :  { %v2565_v51 = vpop.f32.mrf.mxu1 }
 0xa80   :  { %2629 = vst [vmem:[#allocation14 + $0x20] sm:$0xff] %v2613_v3  ;;  %v2616_v27 = vmax.f32 %v2574_v36, 0.0  ;;  %v2566_v26 = vadd.f32 %v4088_v53, %v2565_v51 }
 0xa81   :  { %v3436_v59 = vpop.f32.mrf.mxu1 }
 0xa82   :  { %2632 = vst [vmem:[#allocation14 + $0x38] sm:$0xff] %v2616_v27  ;;  %v2614_v37 = vmax.f32 %v2566_v26, 0.0  ;;  %v2587_v5 = vadd.f32 %v3436_v59, %v4088_v53 }
 0xa83   :  { %v2578_v24 = vpop.f32.mrf.mxu1 }
 0xa84   :  { %2630 = vst [vmem:[#allocation14 + $0x28] sm:$0xff] %v2614_v37  ;;  %v2619_v25 = vmax.f32 %v2587_v5, 0.0  ;;  %v2579_v28 = vadd.f32 %v4088_v53, %v2578_v24 }
 0xa85   :  { %v3437_v29 = vpop.f32.mrf.mxu1 }
 0xa86   :  { %2635 = vst [vmem:[#allocation14 + $0x50] sm:$0xff] %v2619_v25  ;;  %v2617_v30 = vmax.f32 %v2579_v28, 0.0  ;;  %v2590_v17 = vadd.f32 %v3437_v29, %v4088_v53 }
 0xa87   :  { %v2581_v47 = vpop.f32.mrf.mxu1 }
 0xa88   :  { %2633 = vst [vmem:[#allocation14 + $0x40] sm:$0xff] %v2617_v30  ;;  %v2620_v38 = vmax.f32 %v2590_v17, 0.0  ;;  %v2582_v40 = vadd.f32 %v4088_v53, %v2581_v47 }
 0xa89   :  { %v3440_v41 = vpop.f32.mrf.mxu1 }
 0xa8a   :  { %2636 = vst [vmem:[#allocation14 + $0x58] sm:$0xff] %v2620_v38  ;;  %v2618_v42 = vmax.f32 %v2582_v40, 0.0  ;;  %v2603_v18 = vadd.f32 %v3440_v41, %v4088_v53 }
 0xa8b   :  { %v2594_v6 = vpop.f32.mrf.mxu1 }
 0xa8c   :  { %2634 = vst [vmem:[#allocation14 + $0x48] sm:$0xff] %v2618_v42  ;;  %v2623_v43 = vmax.f32 %v2603_v18, 0.0  ;;  %v2595_v44 = vadd.f32 %v4088_v53, %v2594_v6 }
 0xa8d   :  { %v3441_v19 = vpop.f32.mrf.mxu1 }
 0xa8e   :  { %2639 = vst [vmem:[#allocation14 + $0x70] sm:$0xff] %v2623_v43  ;;  %v2621_v8 = vmax.f32 %v2595_v44, 0.0  ;;  %v2606_v11 = vadd.f32 %v3441_v19, %v4088_v53 }
 0xa8f   :  { %v2597_v14 = vpop.f32.mrf.mxu1 }
 0xa90   :  { %2637 = vst [vmem:[#allocation14 + $0x60] sm:$0xff] %v2621_v8  ;;  %v2624_v45 = vmax.f32 %v2606_v11, 0.0  ;;  %v2598_v20 = vadd.f32 %v4088_v53, %v2597_v14 }
 0xa92   :  { %2640 = vst [vmem:[#allocation14 + $0x78] sm:$0xff] %v2624_v45  ;;  %v2622_v9 = vmax.f32 %v2598_v20, 0.0 }
 0xa94   :  { %2638 = vst [vmem:[#allocation14 + $0x68] sm:$0xff] %v2622_v9 }
 0xa95   :  { %3709 = shalt.err (!%p3706_p11)
}
 0xa96   :  { %2652 = dma.vmem_to_hbm [thread:$0]  %s2647_s14, 2048, %s4124_s12, [#allocation4], %s3729_s24, %s3729_s24, %s3730_s25  }
 0xa97   :  { %3726 = dma.done.wait [#allocation4], 2048  }
 0xa98   :  { %3727 = vsyncadd [#allocation4], 4294965248 }
 0xa99   :  { %2656 = vsyncpa [#allocation3], 1 }
 0xa9a   :  { %2657 = vsyncpa [#allocation6], 1 }
 0xa9b   :  { %2658 = vsyncpa [#allocation9], 1 }
 0xa9c   :  { %2659 = vsyncpa [#allocation12], 1 }
 0xa9d   :  { %2660 = vsyncpa [#allocation4], 1 }

</bundles_post_ra>
